<compile_context>
chip_gen: v5e
topology: v5e:2x2
jax: 0.10.0
libtpu: 0.0.40
codegen_flags: <defaults>
</compile_context>

<pallas_src>
import numpy as np

import jax
import jax.numpy as jnp
from jax import lax
from jax.experimental import pallas as pl
from jax.experimental.pallas import tpu as pltpu

# ---------------------------------------------------------------------------
# Fixed configuration (mirrors the synthetic PyTorch module)
# ---------------------------------------------------------------------------
B = 2              # batch
CIN = 4            # input channels
C = 8              # conv channels (channels=[8, 8])
H = W = 16         # spatial size (3x3 / stride 1 / pad 1 convs keep it)
HIDDEN = 32        # hidden_dims=[32]
NCLASSES = 10
LANES = W * C      # 128: lane width of the conv activation slabs
NPAD = 128         # fc2 outputs padded to a full 128-lane slab


# ---------------------------------------------------------------------------
# The single fused kernel
# ---------------------------------------------------------------------------
def _cnn_fused_kernel(x_ref, w1_ref, b1_ref, w2_ref, b2_ref,
                      f1w_ref, f1b_ref, f2w_ref, f2b_ref, out_ref,
                      slab1_ref, slab2_ref, feat_ref):
    """Whole CNN forward, fully VMEM-resident, batch folded into M.

    x_ref  : (B*H, 128)        rows = b*16 + h, lanes [0,64) = w*CIN+ci, rest 0
    w1_ref : (576, 128)  bf16  9 conv1 taps stacked along K (kron(I_16, W.T))
    b1_ref : (1, 128)    f32   conv1 bias tiled over the 16 w-positions
    w2_ref : (1152, 128) bf16  9 conv2 taps stacked along K
    b2_ref : (1, 128)    f32
    f1w_ref: (1024, 32)  bf16  fc1; flatten permutation + zero odd-w rows folded
    f1b_ref: (1, 32)     f32
    f2w_ref: (32, 128)   bf16  fc2 weights zero-padded to 128 output lanes
    f2b_ref: (1, 128)    f32
    out_ref: (B, 128)    f32   logits (cols >= 10 are zero)
    slab1_ref: VMEM (B*H, 9*64)   bf16  conv1 im2col slab
    slab2_ref: VMEM (B*H, 9*128)  bf16  conv2 im2col slab
    feat_ref : VMEM (B, 1024)     bf16  pooled features (even rows only)
    """
    nb = out_ref.shape[0]
    nrows = nb * H

    # Per-image row index (H is a power of two) and lane index -> boundary masks.
    himg = lax.broadcasted_iota(jnp.int32, (nrows, 1), 0) & (H - 1)
    row_ok = {-1: himg >= 1, 1: himg <= H - 2}
    lane = lax.broadcasted_iota(jnp.int32, (1, LANES), 1)
    col_ok = {-1: lane >= C, 1: lane < (W - 1) * C}

    def _roll(v, shift, axis):
        # Normalize to a positive static shift; pltpu.roll == jnp.roll semantics.
        return pltpu.roll(v, shift=shift % v.shape[axis], axis=axis)

    # ---- conv1: build (B*H, 9*64) im2col slab, taps along K -----------------
    # Input lanes [64,128) are zero, so lane rolls by +-CIN wrap zeros into the
    # w=0 / w=15 boundary positions; only row boundaries need masking.
    x = x_ref[...]
    for i in range(3):
        di = i - 1
        xr = x if di == 0 else _roll(x, -di, 0)
        for j in range(3):
            dj = j - 1
            xs = xr if dj == 0 else _roll(xr, -dj * CIN, 1)
            piece = xs[:, :W * CIN]                               # (32, 64)
            if di != 0:
                piece = jnp.where(row_ok[di], piece, 0.0)
            t = i * 3 + j
            slab1_ref[:, t * W * CIN:(t + 1) * W * CIN] = piece.astype(jnp.bfloat16)

    a1 = jnp.dot(slab1_ref[...], w1_ref[...], preferred_element_type=jnp.float32)
    a1 = jnp.maximum(a1 + b1_ref[...], 0.0)                       # (32, 128) f32

    # ---- conv2: build (B*H, 9*128) im2col slab ------------------------------
    for i in range(3):
        di = i - 1
        ar = a1 if di == 0 else _roll(a1, -di, 0)
        for j in range(3):
            dj = j - 1
            piece = ar if dj == 0 else _roll(ar, -dj * C, 1)      # (32, 128)
            if di != 0 and dj != 0:
                piece = jnp.where(row_ok[di] & col_ok[dj], piece, 0.0)
            elif di != 0:
                piece = jnp.where(row_ok[di], piece, 0.0)
            elif dj != 0:
                piece = jnp.where(col_ok[dj], piece, 0.0)
            t = i * 3 + j
            slab2_ref[:, t * LANES:(t + 1) * LANES] = piece.astype(jnp.bfloat16)

    a2 = jnp.dot(slab2_ref[...], w2_ref[...], preferred_element_type=jnp.float32)
    a2 = jnp.maximum(a2 + b2_ref[...], 0.0)                       # (32, 128) f32

    # ---- 2x2 max-pool, stride 2: two rolled maxima (wrap hits don't-cares) --
    rm = jnp.maximum(a2, _roll(a2, -1, 0))
    cm = jnp.maximum(rm, _roll(rm, -C, 1))                        # valid at even h / even w

    # ---- gather the 8 valid (even) rows of each image into (B, 1024) --------
    for yo in range(H // 2):
        rows = [cm[b * H + 2 * yo:b * H + 2 * yo + 1, :] for b in range(nb)]
        feat_ref[:, yo * LANES:(yo + 1) * LANES] = (
            jnp.concatenate(rows, axis=0).astype(jnp.bfloat16))

    # ---- fc1 (+ReLU) and fc2: two small dots, logits straight to the output -
    h1 = jnp.dot(feat_ref[...], f1w_ref[...], preferred_element_type=jnp.float32)
    h1 = jnp.maximum(h1 + f1b_ref[...], 0.0)                      # (B, 32)
    out_ref[...] = (jnp.dot(h1.astype(jnp.bfloat16), f2w_ref[...],
                            preferred_element_type=jnp.float32) + f2b_ref[...])


# ---------------------------------------------------------------------------
# One-time weight re-layout (outside jit / outside the kernel)
# ---------------------------------------------------------------------------
def prepare_params(params):
    """Fold layout work (per-tap kron blocks stacked along K, flatten
    permutation, odd-w zero rows, lane padding) into the weights once; ship
    matmul weights in bf16, biases in f32."""
    eye = jnp.eye(W, dtype=jnp.float32)

    def conv_kmat(w_oihw):
        # torch (Cout, Cin, 3, 3) -> (9*W*Cin, W*Cout): taps stacked along K,
        # each tap the block-diagonal kron(I_W, W[:, :, i, j].T).
        blocks = [jnp.kron(eye, w_oihw[:, :, i, j].T.astype(jnp.float32))
                  for i in range(3) for j in range(3)]
        return jnp.concatenate(blocks, axis=0).astype(jnp.bfloat16)

    # fc1: torch flatten of the pooled (C=8, 8, 8) map is c*64 + yo*8 + xo.
    # Kernel features are feat[b, yo*128 + w*8 + c] with only even w valid, so
    # interleave zeros for odd w and flatten to (1024, 32).
    f1 = params["fc1_w"].astype(jnp.float32).reshape(C, H // 2, W // 2, HIDDEN)
    f1 = jnp.transpose(f1, (1, 2, 0, 3))                     # (yo, xo, c, n)
    f1 = jnp.stack([f1, jnp.zeros_like(f1)], axis=2)         # (yo, xo, even/odd, c, n)
    f1w = f1.reshape((H // 2) * LANES, HIDDEN).astype(jnp.bfloat16)   # (1024, 32)

    f2w = jnp.zeros((HIDDEN, NPAD), jnp.float32).at[:, :NCLASSES].set(
        params["fc2_w"].astype(jnp.float32)).astype(jnp.bfloat16)
    f2b = jnp.zeros((1, NPAD), jnp.float32).at[:, :NCLASSES].set(
        params["fc2_b"].astype(jnp.float32).reshape(1, NCLASSES))

    return dict(
        w1k=conv_kmat(params["conv1_w"]),                                    # (576, 128)
        b1=jnp.tile(params["conv1_b"].astype(jnp.float32), W).reshape(1, LANES),
        w2k=conv_kmat(params["conv2_w"]),                                    # (1152, 128)
        b2=jnp.tile(params["conv2_b"].astype(jnp.float32), W).reshape(1, LANES),
        f1w=f1w,
        f1b=params["fc1_b"].astype(jnp.float32).reshape(1, HIDDEN),
        f2w=f2w,
        f2b=f2b,
    )


# ---------------------------------------------------------------------------
# Forward wrapper: one pallas_call, trivial input/output prep around it
# ---------------------------------------------------------------------------
@jax.jit
def cnn_forward(x_nchw, kp):
    """x_nchw: (B, 4, 16, 16) float32 -> logits (B, 10)."""
    b = x_nchw.shape[0]
    # NCHW -> (B*H, W*CIN) lane-dense rows, zero-padded to 128 lanes so in-kernel
    # lane rolls wrap zeros into the w-boundary positions.
    x = jnp.transpose(x_nchw, (0, 2, 3, 1)).reshape(b * H, W * CIN)
    x = jnp.pad(x.astype(jnp.float32), ((0, 0), (0, LANES - W * CIN)))

    out = pl.pallas_call(
        _cnn_fused_kernel,
        out_shape=jax.ShapeDtypeStruct((b, NPAD), jnp.float32),
        in_specs=[
            pl.BlockSpec((b * H, LANES), lambda: (0, 0)),
            pl.BlockSpec((9 * W * CIN, LANES), lambda: (0, 0)),
            pl.BlockSpec((1, LANES), lambda: (0, 0)),
            pl.BlockSpec((9 * LANES, LANES), lambda: (0, 0)),
            pl.BlockSpec((1, LANES), lambda: (0, 0)),
            pl.BlockSpec(((H // 2) * LANES, HIDDEN), lambda: (0, 0)),
            pl.BlockSpec((1, HIDDEN), lambda: (0, 0)),
            pl.BlockSpec((HIDDEN, NPAD), lambda: (0, 0)),
            pl.BlockSpec((1, NPAD), lambda: (0, 0)),
        ],
        out_specs=pl.BlockSpec((b, NPAD), lambda: (0, 0)),
        scratch_shapes=[
            pltpu.VMEM((b * H, 9 * W * CIN), jnp.bfloat16),   # conv1 im2col slab
            pltpu.VMEM((b * H, 9 * LANES), jnp.bfloat16),     # conv2 im2col slab
            pltpu.VMEM((b, (H // 2) * LANES), jnp.bfloat16),  # fc1 features
        ],
        # No grid: whole net is a single program (<1 MB VMEM).  On v7x / bigger
        # batch, grid over batch with dimension_semantics=("parallel",) instead.
    )(x, kp["w1k"], kp["b1"], kp["w2k"], kp["b2"],
      kp["f1w"], kp["f1b"], kp["f2w"], kp["f2b"])
    return out[:, :NCLASSES]


# ---------------------------------------------------------------------------
# Pure-JAX reference of the PyTorch module (for correctness check only)
# ---------------------------------------------------------------------------
def cnn_reference(x_nchw, params):
    hp = jax.lax.Precision.HIGHEST

    def conv_relu(x, w, bias):
        y = jax.lax.conv_general_dilated(
            x, w, window_strides=(1, 1), padding=((1, 1), (1, 1)),
            dimension_numbers=("NCHW", "OIHW", "NCHW"), precision=hp)
        return jax.nn.relu(y + bias.reshape(1, -1, 1, 1))

    h = conv_relu(x_nchw, params["conv1_w"], params["conv1_b"])
    h = conv_relu(h, params["conv2_w"], params["conv2_b"])
    h = jax.lax.reduce_window(h, -jnp.inf, jax.lax.max,
                              (1, 1, 2, 2), (1, 1, 2, 2), "VALID")
    feats = h.reshape(h.shape[0], -1)                         # torch NCHW flatten
    z = jax.nn.relu(jnp.dot(feats, params["fc1_w"], precision=hp) + params["fc1_b"])
    return jnp.dot(z, params["fc2_w"], precision=hp) + params["fc2_b"]


def init_params(key):
    ks = jax.random.split(key, 8)

    def w(k, shape, fan_in):
        return (jax.random.normal(k, shape, jnp.float32) / jnp.sqrt(fan_in)).astype(jnp.float32)

    return {
        # conv weights in PyTorch layout (Cout, Cin, KH, KW)
        "conv1_w": w(ks[0], (C, CIN, 3, 3), CIN * 9),
        "conv1_b": w(ks[1], (C,), CIN * 9),
        "conv2_w": w(ks[2], (C, C, 3, 3), C * 9),
        "conv2_b": w(ks[3], (C,), C * 9),
        # fc weights stored as (in, out)  (== torch weight.T)
        "fc1_w": w(ks[4], (C * (H // 2) * (W // 2), HIDDEN), C * (H // 2) * (W // 2)),
        "fc1_b": w(ks[5], (HIDDEN,), C * (H // 2) * (W // 2)),
        "fc2_w": w(ks[6], (HIDDEN, NCLASSES), HIDDEN),
        "fc2_b": w(ks[7], (NCLASSES,), HIDDEN),
    }


if __name__ == "__main__":
    key = jax.random.PRNGKey(0)
    k_x, k_p = jax.random.split(key)
    x = jax.random.normal(k_x, (B, CIN, H, W), jnp.float32)   # NCHW like PyTorch
    params = init_params(k_p)
    kparams = prepare_params(params)                          # one-time re-layout

    out = cnn_forward(x, kparams)
    out = jax.block_until_ready(out)

    assert out.shape == (B, NCLASSES), out.shape
    assert out.dtype == jnp.float32

    # bf16 matmul operands (f32 accumulate) vs a Precision.HIGHEST f32 reference.
    ref = cnn_reference(x, params)
    np.testing.assert_allclose(np.asarray(out), np.asarray(ref), rtol=5e-2, atol=5e-2)

    print("KERNEL_OK")
</pallas_src>

<mosaic_0001>
module attributes {stable_mosaic.version = 11 : i64} {
  func.func @_cnn_fused_kernel(%arg0: memref<32x128xf32, #tpu.memory_space<vmem>>, %arg1: memref<576x128xbf16, #tpu.memory_space<vmem>>, %arg2: memref<1x128xf32, #tpu.memory_space<vmem>>, %arg3: memref<1152x128xbf16, #tpu.memory_space<vmem>>, %arg4: memref<1x128xf32, #tpu.memory_space<vmem>>, %arg5: memref<1024x32xbf16, #tpu.memory_space<vmem>>, %arg6: memref<1x32xf32, #tpu.memory_space<vmem>>, %arg7: memref<32x128xbf16, #tpu.memory_space<vmem>>, %arg8: memref<1x128xf32, #tpu.memory_space<vmem>>, %arg9: memref<2x128xf32, #tpu.memory_space<vmem>>, %arg10: memref<32x576xbf16, #tpu.memory_space<vmem>>, %arg11: memref<32x1152xbf16, #tpu.memory_space<vmem>>, %arg12: memref<2x1024xbf16, #tpu.memory_space<vmem>>) attributes {dimension_semantics = [], scalar_prefetch = 0 : i64, scratch_operands = 3 : i64, tpu.core_type = #tpu.core_type<tc>} {
    %0 = tpu.iota {dimensions = array<i32: 0>} : vector<32x1xi32>
    %c15_i32 = arith.constant 15 : i32
    %1 = vector.broadcast %c15_i32 : i32 to vector<32x1xi32>
    %2 = arith.andi %0, %1 : vector<32x1xi32>
    %c1_i32 = arith.constant 1 : i32
    %3 = vector.broadcast %c1_i32 : i32 to vector<32x1xi32>
    %4 = arith.cmpi sge, %2, %3 : vector<32x1xi32>
    %c14_i32 = arith.constant 14 : i32
    %5 = vector.broadcast %c14_i32 : i32 to vector<32x1xi32>
    %6 = arith.cmpi sle, %2, %5 : vector<32x1xi32>
    %7 = tpu.iota {dimensions = array<i32: 1>} : vector<1x128xi32>
    %c8_i32 = arith.constant 8 : i32
    %8 = vector.broadcast %c8_i32 : i32 to vector<1x128xi32>
    %9 = arith.cmpi sge, %7, %8 : vector<1x128xi32>
    %c120_i32 = arith.constant 120 : i32
    %10 = vector.broadcast %c120_i32 : i32 to vector<1x128xi32>
    %11 = arith.cmpi slt, %7, %10 : vector<1x128xi32>
    %c0 = arith.constant 0 : index
    %c0_0 = arith.constant 0 : index
    %12 = vector.load %arg0[%c0, %c0_0] : memref<32x128xf32, #tpu.memory_space<vmem>>, vector<32x128xf32>
    %c1_i32_1 = arith.constant 1 : i32
    %13 = tpu.dynamic_rotate %12 by %c1_i32_1 dim 0 : vector<32x128xf32>, i32 -> vector<32x128xf32>
    %c4_i32 = arith.constant 4 : i32
    %14 = tpu.dynamic_rotate %13 by %c4_i32 dim 1 : vector<32x128xf32>, i32 -> vector<32x128xf32>
    %15 = vector.extract_strided_slice %14 {offsets = [0, 0], sizes = [32, 64], strides = [1, 1]} : vector<32x128xf32> to vector<32x64xf32>
    %cst = arith.constant 0.000000e+00 : f32
    %16 = vector.shape_cast %4 : vector<32x1xi1> to vector<32x1xi1>
    %17 = vector.broadcast %16 : vector<32x1xi1> to vector<32x64xi1>
    %18 = vector.broadcast %cst : f32 to vector<32x64xf32>
    %19 = arith.select %17, %15, %18 : vector<32x64xi1>, vector<32x64xf32>
    %20 = arith.truncf %19 : vector<32x64xf32> to vector<32x64xbf16>
    %c0_2 = arith.constant 0 : index
    %c0_3 = arith.constant 0 : index
    %21 = vector.load %arg10[%c0_2, %c0_3] : memref<32x576xbf16, #tpu.memory_space<vmem>>, vector<32x64xbf16>
    tpu.vector_store %arg10[%c0_2, %c0_3], %20 {strides = array<i32>} : memref<32x576xbf16, #tpu.memory_space<vmem>>, vector<32x64xbf16>,
    %22 = vector.extract_strided_slice %13 {offsets = [0, 0], sizes = [32, 64], strides = [1, 1]} : vector<32x128xf32> to vector<32x64xf32>
    %cst_4 = arith.constant 0.000000e+00 : f32
    %23 = vector.shape_cast %4 : vector<32x1xi1> to vector<32x1xi1>
    %24 = vector.broadcast %23 : vector<32x1xi1> to vector<32x64xi1>
    %25 = vector.broadcast %cst_4 : f32 to vector<32x64xf32>
    %26 = arith.select %24, %22, %25 : vector<32x64xi1>, vector<32x64xf32>
    %27 = arith.truncf %26 : vector<32x64xf32> to vector<32x64xbf16>
    %c0_5 = arith.constant 0 : index
    %c64 = arith.constant 64 : index
    %28 = vector.load %arg10[%c0_5, %c64] : memref<32x576xbf16, #tpu.memory_space<vmem>>, vector<32x64xbf16>
    tpu.vector_store %arg10[%c0_5, %c64], %27 {strides = array<i32>} : memref<32x576xbf16, #tpu.memory_space<vmem>>, vector<32x64xbf16>,
    %c124_i32 = arith.constant 124 : i32
    %29 = tpu.dynamic_rotate %13 by %c124_i32 dim 1 : vector<32x128xf32>, i32 -> vector<32x128xf32>
    %30 = vector.extract_strided_slice %29 {offsets = [0, 0], sizes = [32, 64], strides = [1, 1]} : vector<32x128xf32> to vector<32x64xf32>
    %cst_6 = arith.constant 0.000000e+00 : f32
    %31 = vector.shape_cast %4 : vector<32x1xi1> to vector<32x1xi1>
    %32 = vector.broadcast %31 : vector<32x1xi1> to vector<32x64xi1>
    %33 = vector.broadcast %cst_6 : f32 to vector<32x64xf32>
    %34 = arith.select %32, %30, %33 : vector<32x64xi1>, vector<32x64xf32>
    %35 = arith.truncf %34 : vector<32x64xf32> to vector<32x64xbf16>
    %c0_7 = arith.constant 0 : index
    %c128 = arith.constant 128 : index
    %36 = vector.load %arg10[%c0_7, %c128] : memref<32x576xbf16, #tpu.memory_space<vmem>>, vector<32x64xbf16>
    tpu.vector_store %arg10[%c0_7, %c128], %35 {strides = array<i32>} : memref<32x576xbf16, #tpu.memory_space<vmem>>, vector<32x64xbf16>,
    %c4_i32_8 = arith.constant 4 : i32
    %37 = tpu.dynamic_rotate %12 by %c4_i32_8 dim 1 : vector<32x128xf32>, i32 -> vector<32x128xf32>
    %38 = vector.extract_strided_slice %37 {offsets = [0, 0], sizes = [32, 64], strides = [1, 1]} : vector<32x128xf32> to vector<32x64xf32>
    %39 = arith.truncf %38 : vector<32x64xf32> to vector<32x64xbf16>
    %c0_9 = arith.constant 0 : index
    %c192 = arith.constant 192 : index
    %40 = vector.load %arg10[%c0_9, %c192] : memref<32x576xbf16, #tpu.memory_space<vmem>>, vector<32x64xbf16>
    tpu.vector_store %arg10[%c0_9, %c192], %39 {strides = array<i32>} : memref<32x576xbf16, #tpu.memory_space<vmem>>, vector<32x64xbf16>,
    %41 = vector.extract_strided_slice %12 {offsets = [0, 0], sizes = [32, 64], strides = [1, 1]} : vector<32x128xf32> to vector<32x64xf32>
    %42 = arith.truncf %41 : vector<32x64xf32> to vector<32x64xbf16>
    %c0_10 = arith.constant 0 : index
    %c256 = arith.constant 256 : index
    %43 = vector.load %arg10[%c0_10, %c256] : memref<32x576xbf16, #tpu.memory_space<vmem>>, vector<32x64xbf16>
    tpu.vector_store %arg10[%c0_10, %c256], %42 {strides = array<i32>} : memref<32x576xbf16, #tpu.memory_space<vmem>>, vector<32x64xbf16>,
    %c124_i32_11 = arith.constant 124 : i32
    %44 = tpu.dynamic_rotate %12 by %c124_i32_11 dim 1 : vector<32x128xf32>, i32 -> vector<32x128xf32>
    %45 = vector.extract_strided_slice %44 {offsets = [0, 0], sizes = [32, 64], strides = [1, 1]} : vector<32x128xf32> to vector<32x64xf32>
    %46 = arith.truncf %45 : vector<32x64xf32> to vector<32x64xbf16>
    %c0_12 = arith.constant 0 : index
    %c320 = arith.constant 320 : index
    %47 = vector.load %arg10[%c0_12, %c320] : memref<32x576xbf16, #tpu.memory_space<vmem>>, vector<32x64xbf16>
    tpu.vector_store %arg10[%c0_12, %c320], %46 {strides = array<i32>} : memref<32x576xbf16, #tpu.memory_space<vmem>>, vector<32x64xbf16>,
    %c31_i32 = arith.constant 31 : i32
    %48 = tpu.dynamic_rotate %12 by %c31_i32 dim 0 : vector<32x128xf32>, i32 -> vector<32x128xf32>
    %c4_i32_13 = arith.constant 4 : i32
    %49 = tpu.dynamic_rotate %48 by %c4_i32_13 dim 1 : vector<32x128xf32>, i32 -> vector<32x128xf32>
    %50 = vector.extract_strided_slice %49 {offsets = [0, 0], sizes = [32, 64], strides = [1, 1]} : vector<32x128xf32> to vector<32x64xf32>
    %cst_14 = arith.constant 0.000000e+00 : f32
    %51 = vector.shape_cast %6 : vector<32x1xi1> to vector<32x1xi1>
    %52 = vector.broadcast %51 : vector<32x1xi1> to vector<32x64xi1>
    %53 = vector.broadcast %cst_14 : f32 to vector<32x64xf32>
    %54 = arith.select %52, %50, %53 : vector<32x64xi1>, vector<32x64xf32>
    %55 = arith.truncf %54 : vector<32x64xf32> to vector<32x64xbf16>
    %c0_15 = arith.constant 0 : index
    %c384 = arith.constant 384 : index
    %56 = vector.load %arg10[%c0_15, %c384] : memref<32x576xbf16, #tpu.memory_space<vmem>>, vector<32x64xbf16>
    tpu.vector_store %arg10[%c0_15, %c384], %55 {strides = array<i32>} : memref<32x576xbf16, #tpu.memory_space<vmem>>, vector<32x64xbf16>,
    %57 = vector.extract_strided_slice %48 {offsets = [0, 0], sizes = [32, 64], strides = [1, 1]} : vector<32x128xf32> to vector<32x64xf32>
    %cst_16 = arith.constant 0.000000e+00 : f32
    %58 = vector.shape_cast %6 : vector<32x1xi1> to vector<32x1xi1>
    %59 = vector.broadcast %58 : vector<32x1xi1> to vector<32x64xi1>
    %60 = vector.broadcast %cst_16 : f32 to vector<32x64xf32>
    %61 = arith.select %59, %57, %60 : vector<32x64xi1>, vector<32x64xf32>
    %62 = arith.truncf %61 : vector<32x64xf32> to vector<32x64xbf16>
    %c0_17 = arith.constant 0 : index
    %c448 = arith.constant 448 : index
    %63 = vector.load %arg10[%c0_17, %c448] : memref<32x576xbf16, #tpu.memory_space<vmem>>, vector<32x64xbf16>
    tpu.vector_store %arg10[%c0_17, %c448], %62 {strides = array<i32>} : memref<32x576xbf16, #tpu.memory_space<vmem>>, vector<32x64xbf16>,
    %c124_i32_18 = arith.constant 124 : i32
    %64 = tpu.dynamic_rotate %48 by %c124_i32_18 dim 1 : vector<32x128xf32>, i32 -> vector<32x128xf32>
    %65 = vector.extract_strided_slice %64 {offsets = [0, 0], sizes = [32, 64], strides = [1, 1]} : vector<32x128xf32> to vector<32x64xf32>
    %cst_19 = arith.constant 0.000000e+00 : f32
    %66 = vector.shape_cast %6 : vector<32x1xi1> to vector<32x1xi1>
    %67 = vector.broadcast %66 : vector<32x1xi1> to vector<32x64xi1>
    %68 = vector.broadcast %cst_19 : f32 to vector<32x64xf32>
    %69 = arith.select %67, %65, %68 : vector<32x64xi1>, vector<32x64xf32>
    %70 = arith.truncf %69 : vector<32x64xf32> to vector<32x64xbf16>
    %c0_20 = arith.constant 0 : index
    %c512 = arith.constant 512 : index
    %71 = vector.load %arg10[%c0_20, %c512] : memref<32x576xbf16, #tpu.memory_space<vmem>>, vector<32x64xbf16>
    tpu.vector_store %arg10[%c0_20, %c512], %70 {strides = array<i32>} : memref<32x576xbf16, #tpu.memory_space<vmem>>, vector<32x64xbf16>,
    %c0_21 = arith.constant 0 : index
    %c0_22 = arith.constant 0 : index
    %72 = vector.load %arg10[%c0_21, %c0_22] : memref<32x576xbf16, #tpu.memory_space<vmem>>, vector<32x576xbf16>
    %c0_23 = arith.constant 0 : index
    %c0_24 = arith.constant 0 : index
    %73 = vector.load %arg1[%c0_23, %c0_24] : memref<576x128xbf16, #tpu.memory_space<vmem>>, vector<576x128xbf16>
    %cst_25 = arith.constant dense<0.000000e+00> : vector<32x128xf32>
    %74 = tpu.matmul %72, %73, %cst_25 {dimension_numbers = #tpu.dot_dimension_numbers<[1], [0], [0], [1], [0, 0, 1, 1], [], []>} : vector<32x576xbf16>, vector<576x128xbf16>, vector<32x128xf32> -> vector<32x128xf32>
    %c0_26 = arith.constant 0 : index
    %c0_27 = arith.constant 0 : index
    %75 = vector.load %arg2[%c0_26, %c0_27] : memref<1x128xf32, #tpu.memory_space<vmem>>, vector<1x128xf32>
    %76 = vector.broadcast %75 : vector<1x128xf32> to vector<32x128xf32>
    %77 = arith.addf %74, %76 : vector<32x128xf32>
    %cst_28 = arith.constant 0.000000e+00 : f32
    %78 = vector.broadcast %cst_28 : f32 to vector<32x128xf32>
    %79 = arith.maximumf %77, %78 : vector<32x128xf32>
    %c1_i32_29 = arith.constant 1 : i32
    %80 = tpu.dynamic_rotate %79 by %c1_i32_29 dim 0 : vector<32x128xf32>, i32 -> vector<32x128xf32>
    %c8_i32_30 = arith.constant 8 : i32
    %81 = tpu.dynamic_rotate %80 by %c8_i32_30 dim 1 : vector<32x128xf32>, i32 -> vector<32x128xf32>
    %82 = vector.broadcast %4 : vector<32x1xi1> to vector<32x128xi1>
    %83 = vector.broadcast %9 : vector<1x128xi1> to vector<32x128xi1>
    %84 = arith.andi %82, %83 : vector<32x128xi1>
    %cst_31 = arith.constant 0.000000e+00 : f32
    %85 = vector.broadcast %cst_31 : f32 to vector<32x128xf32>
    %86 = arith.select %84, %81, %85 : vector<32x128xi1>, vector<32x128xf32>
    %87 = arith.truncf %86 : vector<32x128xf32> to vector<32x128xbf16>
    %c0_32 = arith.constant 0 : index
    %c0_33 = arith.constant 0 : index
    %88 = vector.load %arg11[%c0_32, %c0_33] : memref<32x1152xbf16, #tpu.memory_space<vmem>>, vector<32x128xbf16>
    tpu.vector_store %arg11[%c0_32, %c0_33], %87 {strides = array<i32>} : memref<32x1152xbf16, #tpu.memory_space<vmem>>, vector<32x128xbf16>,
    %cst_34 = arith.constant 0.000000e+00 : f32
    %89 = vector.shape_cast %4 : vector<32x1xi1> to vector<32x1xi1>
    %90 = vector.broadcast %89 : vector<32x1xi1> to vector<32x128xi1>
    %91 = vector.broadcast %cst_34 : f32 to vector<32x128xf32>
    %92 = arith.select %90, %80, %91 : vector<32x128xi1>, vector<32x128xf32>
    %93 = arith.truncf %92 : vector<32x128xf32> to vector<32x128xbf16>
    %c0_35 = arith.constant 0 : index
    %c128_36 = arith.constant 128 : index
    %94 = vector.load %arg11[%c0_35, %c128_36] : memref<32x1152xbf16, #tpu.memory_space<vmem>>, vector<32x128xbf16>
    tpu.vector_store %arg11[%c0_35, %c128_36], %93 {strides = array<i32>} : memref<32x1152xbf16, #tpu.memory_space<vmem>>, vector<32x128xbf16>,
    %c120_i32_37 = arith.constant 120 : i32
    %95 = tpu.dynamic_rotate %80 by %c120_i32_37 dim 1 : vector<32x128xf32>, i32 -> vector<32x128xf32>
    %96 = vector.broadcast %4 : vector<32x1xi1> to vector<32x128xi1>
    %97 = vector.broadcast %11 : vector<1x128xi1> to vector<32x128xi1>
    %98 = arith.andi %96, %97 : vector<32x128xi1>
    %cst_38 = arith.constant 0.000000e+00 : f32
    %99 = vector.broadcast %cst_38 : f32 to vector<32x128xf32>
    %100 = arith.select %98, %95, %99 : vector<32x128xi1>, vector<32x128xf32>
    %101 = arith.truncf %100 : vector<32x128xf32> to vector<32x128xbf16>
    %c0_39 = arith.constant 0 : index
    %c256_40 = arith.constant 256 : index
    %102 = vector.load %arg11[%c0_39, %c256_40] : memref<32x1152xbf16, #tpu.memory_space<vmem>>, vector<32x128xbf16>
    tpu.vector_store %arg11[%c0_39, %c256_40], %101 {strides = array<i32>} : memref<32x1152xbf16, #tpu.memory_space<vmem>>, vector<32x128xbf16>,
    %c8_i32_41 = arith.constant 8 : i32
    %103 = tpu.dynamic_rotate %79 by %c8_i32_41 dim 1 : vector<32x128xf32>, i32 -> vector<32x128xf32>
    %cst_42 = arith.constant 0.000000e+00 : f32
    %104 = vector.shape_cast %9 : vector<1x128xi1> to vector<1x128xi1>
    %105 = vector.broadcast %104 : vector<1x128xi1> to vector<32x128xi1>
    %106 = vector.broadcast %cst_42 : f32 to vector<32x128xf32>
    %107 = arith.select %105, %103, %106 : vector<32x128xi1>, vector<32x128xf32>
    %108 = arith.truncf %107 : vector<32x128xf32> to vector<32x128xbf16>
    %c0_43 = arith.constant 0 : index
    %c384_44 = arith.constant 384 : index
    %109 = vector.load %arg11[%c0_43, %c384_44] : memref<32x1152xbf16, #tpu.memory_space<vmem>>, vector<32x128xbf16>
    tpu.vector_store %arg11[%c0_43, %c384_44], %108 {strides = array<i32>} : memref<32x1152xbf16, #tpu.memory_space<vmem>>, vector<32x128xbf16>,
    %110 = arith.truncf %79 : vector<32x128xf32> to vector<32x128xbf16>
    %c0_45 = arith.constant 0 : index
    %c512_46 = arith.constant 512 : index
    %111 = vector.load %arg11[%c0_45, %c512_46] : memref<32x1152xbf16, #tpu.memory_space<vmem>>, vector<32x128xbf16>
    tpu.vector_store %arg11[%c0_45, %c512_46], %110 {strides = array<i32>} : memref<32x1152xbf16, #tpu.memory_space<vmem>>, vector<32x128xbf16>,
    %c120_i32_47 = arith.constant 120 : i32
    %112 = tpu.dynamic_rotate %79 by %c120_i32_47 dim 1 : vector<32x128xf32>, i32 -> vector<32x128xf32>
    %cst_48 = arith.constant 0.000000e+00 : f32
    %113 = vector.shape_cast %11 : vector<1x128xi1> to vector<1x128xi1>
    %114 = vector.broadcast %113 : vector<1x128xi1> to vector<32x128xi1>
    %115 = vector.broadcast %cst_48 : f32 to vector<32x128xf32>
    %116 = arith.select %114, %112, %115 : vector<32x128xi1>, vector<32x128xf32>
    %117 = arith.truncf %116 : vector<32x128xf32> to vector<32x128xbf16>
    %c0_49 = arith.constant 0 : index
    %c640 = arith.constant 640 : index
    %118 = vector.load %arg11[%c0_49, %c640] : memref<32x1152xbf16, #tpu.memory_space<vmem>>, vector<32x128xbf16>
    tpu.vector_store %arg11[%c0_49, %c640], %117 {strides = array<i32>} : memref<32x1152xbf16, #tpu.memory_space<vmem>>, vector<32x128xbf16>,
    %c31_i32_50 = arith.constant 31 : i32
    %119 = tpu.dynamic_rotate %79 by %c31_i32_50 dim 0 : vector<32x128xf32>, i32 -> vector<32x128xf32>
    %c8_i32_51 = arith.constant 8 : i32
    %120 = tpu.dynamic_rotate %119 by %c8_i32_51 dim 1 : vector<32x128xf32>, i32 -> vector<32x128xf32>
    %121 = vector.broadcast %6 : vector<32x1xi1> to vector<32x128xi1>
    %122 = vector.broadcast %9 : vector<1x128xi1> to vector<32x128xi1>
    %123 = arith.andi %121, %122 : vector<32x128xi1>
    %cst_52 = arith.constant 0.000000e+00 : f32
    %124 = vector.broadcast %cst_52 : f32 to vector<32x128xf32>
    %125 = arith.select %123, %120, %124 : vector<32x128xi1>, vector<32x128xf32>
    %126 = arith.truncf %125 : vector<32x128xf32> to vector<32x128xbf16>
    %c0_53 = arith.constant 0 : index
    %c768 = arith.constant 768 : index
    %127 = vector.load %arg11[%c0_53, %c768] : memref<32x1152xbf16, #tpu.memory_space<vmem>>, vector<32x128xbf16>
    tpu.vector_store %arg11[%c0_53, %c768], %126 {strides = array<i32>} : memref<32x1152xbf16, #tpu.memory_space<vmem>>, vector<32x128xbf16>,
    %cst_54 = arith.constant 0.000000e+00 : f32
    %128 = vector.shape_cast %6 : vector<32x1xi1> to vector<32x1xi1>
    %129 = vector.broadcast %128 : vector<32x1xi1> to vector<32x128xi1>
    %130 = vector.broadcast %cst_54 : f32 to vector<32x128xf32>
    %131 = arith.select %129, %119, %130 : vector<32x128xi1>, vector<32x128xf32>
    %132 = arith.truncf %131 : vector<32x128xf32> to vector<32x128xbf16>
    %c0_55 = arith.constant 0 : index
    %c896 = arith.constant 896 : index
    %133 = vector.load %arg11[%c0_55, %c896] : memref<32x1152xbf16, #tpu.memory_space<vmem>>, vector<32x128xbf16>
    tpu.vector_store %arg11[%c0_55, %c896], %132 {strides = array<i32>} : memref<32x1152xbf16, #tpu.memory_space<vmem>>, vector<32x128xbf16>,
    %c120_i32_56 = arith.constant 120 : i32
    %134 = tpu.dynamic_rotate %119 by %c120_i32_56 dim 1 : vector<32x128xf32>, i32 -> vector<32x128xf32>
    %135 = vector.broadcast %6 : vector<32x1xi1> to vector<32x128xi1>
    %136 = vector.broadcast %11 : vector<1x128xi1> to vector<32x128xi1>
    %137 = arith.andi %135, %136 : vector<32x128xi1>
    %cst_57 = arith.constant 0.000000e+00 : f32
    %138 = vector.broadcast %cst_57 : f32 to vector<32x128xf32>
    %139 = arith.select %137, %134, %138 : vector<32x128xi1>, vector<32x128xf32>
    %140 = arith.truncf %139 : vector<32x128xf32> to vector<32x128xbf16>
    %c0_58 = arith.constant 0 : index
    %c1024 = arith.constant 1024 : index
    %141 = vector.load %arg11[%c0_58, %c1024] : memref<32x1152xbf16, #tpu.memory_space<vmem>>, vector<32x128xbf16>
    tpu.vector_store %arg11[%c0_58, %c1024], %140 {strides = array<i32>} : memref<32x1152xbf16, #tpu.memory_space<vmem>>, vector<32x128xbf16>,
    %c0_59 = arith.constant 0 : index
    %c0_60 = arith.constant 0 : index
    %142 = vector.load %arg11[%c0_59, %c0_60] : memref<32x1152xbf16, #tpu.memory_space<vmem>>, vector<32x1152xbf16>
    %c0_61 = arith.constant 0 : index
    %c0_62 = arith.constant 0 : index
    %143 = vector.load %arg3[%c0_61, %c0_62] : memref<1152x128xbf16, #tpu.memory_space<vmem>>, vector<1152x128xbf16>
    %cst_63 = arith.constant dense<0.000000e+00> : vector<32x128xf32>
    %144 = tpu.matmul %142, %143, %cst_63 {dimension_numbers = #tpu.dot_dimension_numbers<[1], [0], [0], [1], [0, 0, 1, 1], [], []>} : vector<32x1152xbf16>, vector<1152x128xbf16>, vector<32x128xf32> -> vector<32x128xf32>
    %c0_64 = arith.constant 0 : index
    %c0_65 = arith.constant 0 : index
    %145 = vector.load %arg4[%c0_64, %c0_65] : memref<1x128xf32, #tpu.memory_space<vmem>>, vector<1x128xf32>
    %146 = vector.broadcast %145 : vector<1x128xf32> to vector<32x128xf32>
    %147 = arith.addf %144, %146 : vector<32x128xf32>
    %cst_66 = arith.constant 0.000000e+00 : f32
    %148 = vector.broadcast %cst_66 : f32 to vector<32x128xf32>
    %149 = arith.maximumf %147, %148 : vector<32x128xf32>
    %c31_i32_67 = arith.constant 31 : i32
    %150 = tpu.dynamic_rotate %149 by %c31_i32_67 dim 0 : vector<32x128xf32>, i32 -> vector<32x128xf32>
    %151 = arith.maximumf %149, %150 : vector<32x128xf32>
    %c120_i32_68 = arith.constant 120 : i32
    %152 = tpu.dynamic_rotate %151 by %c120_i32_68 dim 1 : vector<32x128xf32>, i32 -> vector<32x128xf32>
    %153 = arith.maximumf %151, %152 : vector<32x128xf32>
    %154 = vector.extract_strided_slice %153 {offsets = [0, 0], sizes = [1, 128], strides = [1, 1]} : vector<32x128xf32> to vector<1x128xf32>
    %155 = vector.extract_strided_slice %153 {offsets = [16, 0], sizes = [1, 128], strides = [1, 1]} : vector<32x128xf32> to vector<1x128xf32>
    %156 = tpu.concatenate %154, %155 in 0 : vector<1x128xf32>, vector<1x128xf32> -> vector<2x128xf32>
    %157 = arith.truncf %156 : vector<2x128xf32> to vector<2x128xbf16>
    %c0_69 = arith.constant 0 : index
    %c0_70 = arith.constant 0 : index
    %158 = vector.load %arg12[%c0_69, %c0_70] : memref<2x1024xbf16, #tpu.memory_space<vmem>>, vector<2x128xbf16>
    tpu.vector_store %arg12[%c0_69, %c0_70], %157 {strides = array<i32>} : memref<2x1024xbf16, #tpu.memory_space<vmem>>, vector<2x128xbf16>,
    %159 = vector.extract_strided_slice %153 {offsets = [2, 0], sizes = [1, 128], strides = [1, 1]} : vector<32x128xf32> to vector<1x128xf32>
    %160 = vector.extract_strided_slice %153 {offsets = [18, 0], sizes = [1, 128], strides = [1, 1]} : vector<32x128xf32> to vector<1x128xf32>
    %161 = tpu.concatenate %159, %160 in 0 : vector<1x128xf32>, vector<1x128xf32> -> vector<2x128xf32>
    %162 = arith.truncf %161 : vector<2x128xf32> to vector<2x128xbf16>
    %c0_71 = arith.constant 0 : index
    %c128_72 = arith.constant 128 : index
    %163 = vector.load %arg12[%c0_71, %c128_72] : memref<2x1024xbf16, #tpu.memory_space<vmem>>, vector<2x128xbf16>
    tpu.vector_store %arg12[%c0_71, %c128_72], %162 {strides = array<i32>} : memref<2x1024xbf16, #tpu.memory_space<vmem>>, vector<2x128xbf16>,
    %164 = vector.extract_strided_slice %153 {offsets = [4, 0], sizes = [1, 128], strides = [1, 1]} : vector<32x128xf32> to vector<1x128xf32>
    %165 = vector.extract_strided_slice %153 {offsets = [20, 0], sizes = [1, 128], strides = [1, 1]} : vector<32x128xf32> to vector<1x128xf32>
    %166 = tpu.concatenate %164, %165 in 0 : vector<1x128xf32>, vector<1x128xf32> -> vector<2x128xf32>
    %167 = arith.truncf %166 : vector<2x128xf32> to vector<2x128xbf16>
    %c0_73 = arith.constant 0 : index
    %c256_74 = arith.constant 256 : index
    %168 = vector.load %arg12[%c0_73, %c256_74] : memref<2x1024xbf16, #tpu.memory_space<vmem>>, vector<2x128xbf16>
    tpu.vector_store %arg12[%c0_73, %c256_74], %167 {strides = array<i32>} : memref<2x1024xbf16, #tpu.memory_space<vmem>>, vector<2x128xbf16>,
    %169 = vector.extract_strided_slice %153 {offsets = [6, 0], sizes = [1, 128], strides = [1, 1]} : vector<32x128xf32> to vector<1x128xf32>
    %170 = vector.extract_strided_slice %153 {offsets = [22, 0], sizes = [1, 128], strides = [1, 1]} : vector<32x128xf32> to vector<1x128xf32>
    %171 = tpu.concatenate %169, %170 in 0 : vector<1x128xf32>, vector<1x128xf32> -> vector<2x128xf32>
    %172 = arith.truncf %171 : vector<2x128xf32> to vector<2x128xbf16>
    %c0_75 = arith.constant 0 : index
    %c384_76 = arith.constant 384 : index
    %173 = vector.load %arg12[%c0_75, %c384_76] : memref<2x1024xbf16, #tpu.memory_space<vmem>>, vector<2x128xbf16>
    tpu.vector_store %arg12[%c0_75, %c384_76], %172 {strides = array<i32>} : memref<2x1024xbf16, #tpu.memory_space<vmem>>, vector<2x128xbf16>,
    %174 = vector.extract_strided_slice %153 {offsets = [8, 0], sizes = [1, 128], strides = [1, 1]} : vector<32x128xf32> to vector<1x128xf32>
    %175 = vector.extract_strided_slice %153 {offsets = [24, 0], sizes = [1, 128], strides = [1, 1]} : vector<32x128xf32> to vector<1x128xf32>
    %176 = tpu.concatenate %174, %175 in 0 : vector<1x128xf32>, vector<1x128xf32> -> vector<2x128xf32>
    %177 = arith.truncf %176 : vector<2x128xf32> to vector<2x128xbf16>
    %c0_77 = arith.constant 0 : index
    %c512_78 = arith.constant 512 : index
    %178 = vector.load %arg12[%c0_77, %c512_78] : memref<2x1024xbf16, #tpu.memory_space<vmem>>, vector<2x128xbf16>
    tpu.vector_store %arg12[%c0_77, %c512_78], %177 {strides = array<i32>} : memref<2x1024xbf16, #tpu.memory_space<vmem>>, vector<2x128xbf16>,
    %179 = vector.extract_strided_slice %153 {offsets = [10, 0], sizes = [1, 128], strides = [1, 1]} : vector<32x128xf32> to vector<1x128xf32>
    %180 = vector.extract_strided_slice %153 {offsets = [26, 0], sizes = [1, 128], strides = [1, 1]} : vector<32x128xf32> to vector<1x128xf32>
    %181 = tpu.concatenate %179, %180 in 0 : vector<1x128xf32>, vector<1x128xf32> -> vector<2x128xf32>
    %182 = arith.truncf %181 : vector<2x128xf32> to vector<2x128xbf16>
    %c0_79 = arith.constant 0 : index
    %c640_80 = arith.constant 640 : index
    %183 = vector.load %arg12[%c0_79, %c640_80] : memref<2x1024xbf16, #tpu.memory_space<vmem>>, vector<2x128xbf16>
    tpu.vector_store %arg12[%c0_79, %c640_80], %182 {strides = array<i32>} : memref<2x1024xbf16, #tpu.memory_space<vmem>>, vector<2x128xbf16>,
    %184 = vector.extract_strided_slice %153 {offsets = [12, 0], sizes = [1, 128], strides = [1, 1]} : vector<32x128xf32> to vector<1x128xf32>
    %185 = vector.extract_strided_slice %153 {offsets = [28, 0], sizes = [1, 128], strides = [1, 1]} : vector<32x128xf32> to vector<1x128xf32>
    %186 = tpu.concatenate %184, %185 in 0 : vector<1x128xf32>, vector<1x128xf32> -> vector<2x128xf32>
    %187 = arith.truncf %186 : vector<2x128xf32> to vector<2x128xbf16>
    %c0_81 = arith.constant 0 : index
    %c768_82 = arith.constant 768 : index
    %188 = vector.load %arg12[%c0_81, %c768_82] : memref<2x1024xbf16, #tpu.memory_space<vmem>>, vector<2x128xbf16>
    tpu.vector_store %arg12[%c0_81, %c768_82], %187 {strides = array<i32>} : memref<2x1024xbf16, #tpu.memory_space<vmem>>, vector<2x128xbf16>,
    %189 = vector.extract_strided_slice %153 {offsets = [14, 0], sizes = [1, 128], strides = [1, 1]} : vector<32x128xf32> to vector<1x128xf32>
    %190 = vector.extract_strided_slice %153 {offsets = [30, 0], sizes = [1, 128], strides = [1, 1]} : vector<32x128xf32> to vector<1x128xf32>
    %191 = tpu.concatenate %189, %190 in 0 : vector<1x128xf32>, vector<1x128xf32> -> vector<2x128xf32>
    %192 = arith.truncf %191 : vector<2x128xf32> to vector<2x128xbf16>
    %c0_83 = arith.constant 0 : index
    %c896_84 = arith.constant 896 : index
    %193 = vector.load %arg12[%c0_83, %c896_84] : memref<2x1024xbf16, #tpu.memory_space<vmem>>, vector<2x128xbf16>
    tpu.vector_store %arg12[%c0_83, %c896_84], %192 {strides = array<i32>} : memref<2x1024xbf16, #tpu.memory_space<vmem>>, vector<2x128xbf16>,
    %c0_85 = arith.constant 0 : index
    %c0_86 = arith.constant 0 : index
    %194 = vector.load %arg12[%c0_85, %c0_86] : memref<2x1024xbf16, #tpu.memory_space<vmem>>, vector<2x1024xbf16>
    %c0_87 = arith.constant 0 : index
    %c0_88 = arith.constant 0 : index
    %195 = vector.load %arg5[%c0_87, %c0_88] : memref<1024x32xbf16, #tpu.memory_space<vmem>>, vector<1024x32xbf16>
    %cst_89 = arith.constant dense<0.000000e+00> : vector<2x32xf32>
    %196 = tpu.matmul %194, %195, %cst_89 {dimension_numbers = #tpu.dot_dimension_numbers<[1], [0], [0], [1], [0, 0, 1, 1], [], []>} : vector<2x1024xbf16>, vector<1024x32xbf16>, vector<2x32xf32> -> vector<2x32xf32>
    %c0_90 = arith.constant 0 : index
    %c0_91 = arith.constant 0 : index
    %197 = vector.load %arg6[%c0_90, %c0_91] : memref<1x32xf32, #tpu.memory_space<vmem>>, vector<1x32xf32>
    %198 = vector.broadcast %197 : vector<1x32xf32> to vector<2x32xf32>
    %199 = arith.addf %196, %198 : vector<2x32xf32>
    %cst_92 = arith.constant 0.000000e+00 : f32
    %200 = vector.broadcast %cst_92 : f32 to vector<2x32xf32>
    %201 = arith.maximumf %199, %200 : vector<2x32xf32>
    %202 = arith.truncf %201 : vector<2x32xf32> to vector<2x32xbf16>
    %c0_93 = arith.constant 0 : index
    %c0_94 = arith.constant 0 : index
    %203 = vector.load %arg7[%c0_93, %c0_94] : memref<32x128xbf16, #tpu.memory_space<vmem>>, vector<32x128xbf16>
    %cst_95 = arith.constant dense<0.000000e+00> : vector<2x128xf32>
    %204 = tpu.matmul %202, %203, %cst_95 {dimension_numbers = #tpu.dot_dimension_numbers<[1], [0], [0], [1], [0, 0, 1, 1], [], []>} : vector<2x32xbf16>, vector<32x128xbf16>, vector<2x128xf32> -> vector<2x128xf32>
    %c0_96 = arith.constant 0 : index
    %c0_97 = arith.constant 0 : index
    %205 = vector.load %arg8[%c0_96, %c0_97] : memref<1x128xf32, #tpu.memory_space<vmem>>, vector<1x128xf32>
    %206 = vector.broadcast %205 : vector<1x128xf32> to vector<2x128xf32>
    %207 = arith.addf %204, %206 : vector<2x128xf32>
    %c0_98 = arith.constant 0 : index
    %c0_99 = arith.constant 0 : index
    %208 = vector.load %arg9[%c0_98, %c0_99] : memref<2x128xf32, #tpu.memory_space<vmem>>, vector<2x128xf32>
    tpu.vector_store %arg9[%c0_98, %c0_99], %207 {strides = array<i32>} : memref<2x128xf32, #tpu.memory_space<vmem>>, vector<2x128xf32>,
    return
  }
}

</mosaic_0001>

<bundles_post_ra>
// kernel: cnn_forward.1
= control target key start
LH: loop header
LB: loop body
LE: loop exit
PB: predicated region body
PF: predicated region fallthrough
CT: control target
= control target key end

     0   :  { %v34_v2 = vlaneseq  ;;  %s3773_s15 = smov 124   ;;  %s4717_s0 = inlined_call_operand.vmem [shape: f32[32,128], index: 0, kind: input, shape index: {}]   ;;  %s4718_s1 = inlined_call_operand.vmem [shape: bf16[576,128], index: 1, kind: input, shape index: {}]   ;;  %s4719_s2 = inlined_call_operand.vmem [shape: f32[1,128], index: 2, kind: input, shape index: {}]   ;;  %s4720_s3 = inlined_call_operand.vmem [shape: bf16[1152,128], index: 3, kind: input, shape index: {}]   ;;  %s4721_s4 = inlined_call_operand.vmem [shape: f32[1,128], index: 4, kind: input, shape index: {}]   ;;  %s4722_s5 = inlined_call_operand.vmem [shape: bf16[1024,32], index: 5, kind: input, shape index: {}]   ;;  %s4723_s6 = inlined_call_operand.vmem [shape: f32[1,32], index: 6, kind: input, shape index: {}]   ;;  %s4724_s7 = inlined_call_operand.vmem [shape: bf16[32,128], index: 7, kind: input, shape index: {}]   ;;  %s4725_s8 = inlined_call_operand.vmem [shape: f32[1,128], index: 8, kind: input, shape index: {}]   ;;  %s4726_s9 = inlined_call_operand.hbm [shape: f32[2,128], index: 9, kind: output, shape index: {}]  }
   0x1   :  { %v3832_v0 = vld [vmem:[%s4717_s0] sm:$0xff]  ;;  %v3837_v1 = vld [vmem:[%s4717_s0 + $0x8] sm:$0xff]  ;;  %v3842_v3 = vld [vmem:[%s4717_s0 + $0x18] sm:$0xff] }
   0x2   :  { %v3613_v4 = vpack.i.bf16 %v3837_v1, %v3832_v0  ;;  %v59_v5 = vrot.slane %v3832_v0, 7  ;;  %v60_v6 = vrot.slane %v3837_v1, 7  ;;  %v3849_v7 = vshrl.u32 %v34_v2, 7 }
   0x3   :  { %v62_v8 = vrot.slane %v3842_v3, 7 }
   0x4   :  { %3614 = vrot.lane.b32.xlu0 %v3613_v4, %s3773_s15  ;;  %vm63_vm0 = vcmp.lt.s32.totalorder %v3849_v7, 1  ;;  %v39_v9 = vand.u32 15, %v3849_v7 }
   0x5   :  { %14 = vsyncpa [#allocation6], 0  ;;  %v66_v10 = vsel %vm63_vm0, %v59_v5, %v60_v6  ;;  %v67_v11 = vsel %vm63_vm0, %v62_v8, %v59_v5  ;;  %v37_v14 = vadd.s32 16, %v3849_v7  ;;  %s3774_s16 = smov 4   ;;  %s3775_s17 = smov 64   ;;  %v3869_v16 = vld [vmem:[%s4717_s0 + $0x10] sm:$0xff] }
   0x6   :  { %v3623_v12 = vpack.i.bf16 %v66_v10, %v67_v11  ;;  %v102_v13 = vpack.c.bf16 %v66_v10, %v66_v10  ;;  %vm3860_vm1 = vcmp.ge.s32.totalorder %v39_v9, 1  ;;  %v3628_v19 = vpack.i.bf16 %v3842_v3, %v3869_v16  ;;  %v3422_v46 = vld [vmem:[%s4718_s1 + $0x38] sm:$0xff]  ;;  %v3421_v50 = vld [vmem:[%s4718_s1 + $0x30] sm:$0xff]  ;;  %v3420_v58 = vld [vmem:[%s4718_s1 + $0x28] sm:$0xff]  ;;  %s3776_s21 = smov 8   ;;  %s3777_s22 = smov 120  }
   0x7   :  { %v97_v17 = vsel %vm3860_vm1, %v67_v11, 0.0  ;;  %v41_v18 = vand.u32 15, %v37_v14  ;;  %v61_v20 = vrot.slane %v3869_v16, 7  ;;  %v36_v26 = vadd.s32 8, %v3849_v7  ;;  %664 = vmatpush.bf16.msra.mxu0 %v3422_v46  ;;  %v3446_v51 = vld [vmem:[%s4718_s1 + $0xf8] sm:$0xff]  ;;  %v3445_v54 = vld [vmem:[%s4718_s1 + $0xf0] sm:$0xff] }
   0x8   :  { %3624 = vrot.lane.b32.xlu1 %v3623_v12, %s3774_s16  ;;  %111 = vrot.lane.b32.xlu2 %v102_v13, %s3775_s17  ;;  %v101_v21 = vpack.c.bf16 %v97_v17, %v97_v17  ;;  %v218_v29 = vrot.slane %v3832_v0, 1  ;;  %v219_v30 = vrot.slane %v3837_v1, 1  ;;  %v220_v31 = vrot.slane %v3869_v16, 1  ;;  %v3444_v63 = vld [vmem:[%s4718_s1 + $0xe8] sm:$0xff]  ;;  %v3419_v9 = vld [vmem:[%s4718_s1 + $0x20] sm:$0xff]  ;;  %s3778_s14 = smov [#allocation5]  }
   0x9   :  { %vm3877_vm2 = vcmp.ge.s32.totalorder %v41_v18, 1  ;;  %v65_v23 = vsel %vm63_vm0, %v60_v6, %v61_v20  ;;  %v64_v24 = vsel %vm63_vm0, %v61_v20, %v62_v8  ;;  %v40_v32 = vand.u32 15, %v36_v26  ;;  %721 = vmatpush.bf16.msra.mxu3 %v3446_v51  ;;  %v3443_v14 = vld [vmem:[%s4718_s1 + $0xe0] sm:$0xff]  ;;  %v3417_v26 = vld [vmem:[%s4718_s1 + $0x10] sm:$0xff]  ;;  %v3538_v57 = vld [vmem:[%s4720_s3 + $0x228] sm:$0xff]  ;;  %s2585_s0 = sshll.u32 %s4726_s9, 4  ;;  %s2586_s0 = int_to_ptr.hbm [resolvable:$true] %s2585_s0 }
   0xa   :  { %v99_v25 = vsel %vm3877_vm2, %v65_v23, 0.0  ;;  %v3638_v27 = vpack.i.bf16 %v64_v24, %v65_v23  ;;  %vm222_vm3 = vcmp.lt.s32.totalorder %v3849_v7, 7  ;;  %v104_v33 = vpack.c.bf16 %v64_v24, %v64_v24  ;;  %v3513_v22 = vld [vmem:[%s4720_s3 + $0x160] sm:$0xff] }
   0xb   :  { %v103_v28 = vpack.c.bf16 %v99_v25, %v99_v25  ;;  %v224_v34 = vsel %vm222_vm3, %v219_v30, %v220_v31  ;;  %v225_v35 = vsel %vm222_vm3, %v218_v29, %v219_v30  ;;  %vm3901_vm4 = vcmp.le.s32.totalorder %v40_v32, 14  ;;  %665 = vmatpush.bf16.msra.mxu0 %v3421_v50  ;;  %v3442_v25 = vld [vmem:[%s4718_s1 + $0xd8] sm:$0xff]  ;;  %v3416_v32 = vld [vmem:[%s4718_s1 + $0x8] sm:$0xff] }
   0xc   :  { %3619 = vrot.lane.b32.xlu0 %v3613_v4, %s3774_s16  ;;  %v3643_v37 = vpack.i.bf16 %v225_v35, %v224_v34  ;;  %v256_v38 = vsel %vm3901_vm4, %v224_v34, 0.0  ;;  %v221_v39 = vrot.slane %v3842_v3, 1  ;;  %v259_v44 = vpack.c.bf16 %v225_v35, %v225_v35 }
   0xd   :  { %v260_v40 = vpack.c.bf16 %v256_v38, %v256_v38  ;;  %v38_v45 = vadd.s32 24, %v3849_v7  ;;  %722 = vmatpush.bf16.msra.mxu3 %v3445_v54  ;;  %vm92_vm6 = vcmask 519168   ;;  %vm121_vm7 = vcmask 1043968   ;;  %v3563_v7 = vld [vmem:[%s4722_s5 + $0xb0] sm:$0xff] }
   0xe   :  { %v3913_v41 = vsel %vm222_vm3, %v220_v31, %v221_v39  ;;  %v226_v42 = vsel %vm222_vm3, %v221_v39, %v218_v29  ;;  %vm657_vm8 = vcmask 523264  }
   0xf   :  { %v3919_v43 = vpack.i.bf16 %v3913_v41, %v226_v42  ;;  %v42_v49 = vand.u32 15, %v38_v45  ;;  %666 = vmatpush.bf16.msra.mxu0 %v3420_v58 }
  0x10   :  { %3629 = vrot.lane.b32.xlu1 %v3628_v19, %s3773_s15  ;;  %109 = vrot.lane.b32.xlu2 %v101_v21, %s3775_s17 }
  0x11   :  { %vm3939_vm5 = vcmp.le.s32.totalorder %v42_v49, 14  ;;  %723 = vmatpush.bf16.msra.mxu3 %v3444_v63  ;;  %v3441_v63 = vld [vmem:[%s4718_s1 + $0xd0] sm:$0xff] }
  0x12   :  { %v258_v4 = vsel %vm3939_vm5, %v226_v42, 0.0  ;;  %v3415_v42 = vld [vmem:[%s4718_s1] sm:$0xff] }
  0x13   :  { %v262_v13 = vpack.c.bf16 %v258_v4, %v258_v4  ;;  %667 = vmatpush.bf16.msra.mxu0 %v3419_v9  ;;  %v3438_v4 = vld [vmem:[%s4718_s1 + $0xb8] sm:$0xff] }
  0x14   :  { %3634 = vrot.lane.b32.xlu0 %v3628_v19, %s3774_s16  ;;  %v3418_v19 = vld [vmem:[%s4718_s1 + $0x18] sm:$0xff]  ;;  %702 = vmatpush.bf16.msra.mxu2 %v3438_v4 }
  0x15   :  { %724 = vmatpush.bf16.msra.mxu3 %v3443_v14 }
  0x17   :  { %668 = vmatpush.bf16.msra.mxu0 %v3418_v19  ;;  %v3439_v19 = vld [vmem:[%s4718_s1 + $0xc0] sm:$0xff] }
  0x18   :  { %3639 = vrot.lane.b32.xlu1 %v3638_v27, %s3774_s16  ;;  %113 = vrot.lane.b32.xlu2 %v103_v28, %s3775_s17  ;;  %v261_v28 = vpack.c.bf16 %v3913_v41, %v3913_v41 }
  0x19   :  { %725 = vmatpush.bf16.msra.mxu3 %v3442_v25 }
  0x1b   :  { %669 = vmatpush.bf16.msra.mxu0 %v3417_v26 }
  0x1c   :  { %115 = vrot.lane.b32.xlu0 %v104_v33, %s3775_s17 }
  0x1d   :  { %726 = vmatpush.bf16.msra.mxu3 %v3441_v63 }
  0x1f   :  { %670 = vmatpush.bf16.msra.mxu0 %v3416_v32 }
  0x20   :  { %3644 = vrot.lane.b32.xlu1 %v3643_v37, %s3774_s16  ;;  %3649 = vrot.lane.b32.xlu2 %v3623_v12, %s3773_s15 }
  0x23   :  { %671 = vmatpush.bf16.msra.mxu0 %v3415_v42 }
  0x24   :  { %269 = vrot.lane.b32.xlu0 %v260_v40, %s3775_s17 }
  0x28   :  { %3659 = vrot.lane.b32.xlu1 %v3919_v43, %s3774_s16  ;;  %267 = vrot.lane.b32.xlu2 %v259_v44, %s3775_s17  ;;  %s2583_s16 = sshll.u32 %s3778_s14, 4  ;;  %s2584_s16 = int_to_ptr.vmem [resolvable:$true] %s2583_s16 }
  0x2c   :  { %3654 = vrot.lane.b32.xlu0 %v3643_v37, %s3773_s15 }
  0x30   :  { %3664 = vrot.lane.b32.xlu2 %v3638_v27, %s3773_s15 }
  0x62   :  { %v112_v47 = vpop.permute.xlu2 %111 }
  0x6a   :  { %v110_v62 = vpop.permute.xlu2 %109 }
  0x72   :  { %v114_v24 = vpop.permute.xlu2 %113 }
  0x76   :  { %v3615_v48 = vpop.permute.xlu0 %3614 }
  0x77   :  { %v3617_v52 = vunpack.i.h.bf16 %v3615_v48  ;;  %v3616_v53 = vunpack.i.l.bf16 %v3615_v48 }
  0x79   :  { %v195_v55 = vpack.c.bf16 %v3617_v52, %v3617_v52  ;;  %v194_v56 = vpack.c.bf16 %v3616_v53, %v3616_v53 }
  0x7a   :  { %v3625_v59 = vpop.permute.xlu1 %3624  ;;  %v3650_v35 = vpop.permute.xlu2 %3649 }
  0x7b   :  { %204 = vrot.lane.b32.xlu1 %v195_v55, %s3775_s17  ;;  %202 = vrot.lane.b32.xlu0 %v194_v56, %s3775_s17  ;;  %v3627_v60 = vunpack.i.h.bf16 %v3625_v59  ;;  %v3626_v61 = vunpack.i.l.bf16 %v3625_v59  ;;  %v3652_v39 = vunpack.i.h.bf16 %v3650_v35  ;;  %v3651_v40 = vunpack.i.l.bf16 %v3650_v35  ;;  %v3435_v35 = vld [vmem:[%s4718_s1 + $0xa0] sm:$0xff] }
  0x7d   :  { %v89_v6 = vpack.c.bf16 %v3627_v60, %v3627_v60  ;;  %v84_v8 = vsel %vm3860_vm1, %v3626_v61, 0.0  ;;  %v139_v49 = vpack.c.bf16 %v3652_v39, %v3652_v39  ;;  %v134_v50 = vsel %vm3860_vm1, %v3651_v40, 0.0 }
  0x7e   :  { %v3620_v5 = vpop.permute.xlu0 %3619  ;;  %v88_v12 = vpack.c.bf16 %v84_v8, %v84_v8  ;;  %v138_v52 = vpack.c.bf16 %v134_v50, %v134_v50  ;;  %v3433_v50 = vld [vmem:[%s4718_s1 + $0x90] sm:$0xff] }
  0x7f   :  { %v3622_v10 = vunpack.i.h.bf16 %v3620_v5  ;;  %v3621_v11 = vunpack.i.l.bf16 %v3620_v5  ;;  %94 = vst.msk [vmem:[#allocation2 + $0x14] sm:$0xf] %vm92_vm6, %v89_v6  ;;  %v3440_v5 = vld [vmem:[%s4718_s1 + $0xc8] sm:$0xff]  ;;  %v3437_v6 = vld [vmem:[%s4718_s1 + $0xb0] sm:$0xff] }
  0x80   :  { %123 = vst.msk [vmem:[#allocation2 + $0x14] sm:$0xf] %vm121_vm7, %v112_v47  ;;  %727 = vmatpush.bf16.msra.mxu3 %v3440_v5  ;;  %703 = vmatpush.bf16.msra.mxu2 %v3437_v6 }
  0x81   :  { %v155_v17 = vpack.c.bf16 %v3622_v10, %v3622_v10  ;;  %v154_v18 = vpack.c.bf16 %v3621_v11, %v3621_v11  ;;  %93 = vst.msk [vmem:[#allocation2] sm:$0xf] %vm92_vm6, %v88_v12 }
  0x82   :  { %v3630_v20 = vpop.permute.xlu1 %3629  ;;  %122 = vst.msk [vmem:[#allocation2] sm:$0xf] %vm121_vm7, %v110_v62  ;;  %v268_v62 = vpop.permute.xlu2 %267 }
  0x83   :  { %162 = vrot.lane.b32.xlu1 %v154_v18, %s3775_s17  ;;  %164 = vrot.lane.b32.xlu2 %v155_v17, %s3775_s17  ;;  %v3632_v21 = vunpack.i.h.bf16 %v3630_v20  ;;  %v3631_v23 = vunpack.i.l.bf16 %v3630_v20  ;;  %143 = vst.msk [vmem:[#allocation2 + $0x18] sm:$0xf] %vm92_vm6, %v139_v49  ;;  %v3450_v20 = vld [vmem:[%s4718_s1 + $0x118] sm:$0xff]  ;;  %v3427_v49 = vld [vmem:[%s4718_s1 + $0x60] sm:$0xff] }
  0x84   :  { %273 = vrot.lane.b32.xlu0 %v262_v13, %s3775_s17  ;;  %142 = vst.msk [vmem:[#allocation2 + $0x4] sm:$0xf] %vm92_vm6, %v138_v52  ;;  %728 = vmatpush.bf16.msra.mxu3 %v3439_v19 }
  0x85   :  { %v197_v27 = vpack.c.bf16 %v3632_v21, %v3632_v21  ;;  %v196_v30 = vpack.c.bf16 %v3631_v23, %v3631_v23  ;;  %v3430_v23 = vld [vmem:[%s4718_s1 + $0x78] sm:$0xff]  ;;  %744 = vmatpush.bf16.msrb.mxu0 %v3450_v20 }
  0x86   :  { %v3635_v29 = vpop.permute.xlu0 %3634  ;;  %683 = vmatpush.bf16.msra.mxu1 %v3430_v23 }
  0x87   :  { %v3637_v31 = vunpack.i.h.bf16 %v3635_v29  ;;  %v3636_v33 = vunpack.i.l.bf16 %v3635_v29  ;;  %v3407_v47 = vld [vmem:[#allocation2 + $0x10] sm:$0xf0] }
  0x89   :  { %v157_v41 = vpack.c.bf16 %v3637_v31, %v3637_v31  ;;  %v2596_v46 = vld [vmem:[#allocation2] sm:$0xf]  ;;  %v156_v48 = vpack.c.bf16 %v3636_v33, %v3636_v33 }
  0x8a   :  { %v3640_v34 = vpop.permute.xlu1 %3639  ;;  %v2597_v53 = vor.u32 %v3407_v47, %v2596_v46  ;;  %v3665_v11 = vpop.permute.xlu2 %3664  ;;  %v3434_v46 = vld [vmem:[%s4718_s1 + $0x98] sm:$0xff]  ;;  %v179_v47 = vpack.c.bf16 %v3837_v1, %v3837_v1  ;;  %v178_v1 = vpack.c.bf16 %v3832_v0, %v3832_v0  ;;  %v3425_v0 = vld [vmem:[%s4718_s1 + $0x50] sm:$0xff] }
  0x8b   :  { %208 = vrot.lane.b32.xlu1 %v197_v27, %s3775_s17  ;;  %271 = vrot.lane.b32.xlu2 %v261_v28, %s3775_s17  ;;  %v3642_v37 = vunpack.i.h.bf16 %v3640_v34  ;;  %v3641_v38 = vunpack.i.l.bf16 %v3640_v34  ;;  %v3667_v12 = vunpack.i.h.bf16 %v3665_v11  ;;  %v3666_v13 = vunpack.i.l.bf16 %v3665_v11  ;;  %v3429_v34 = vld [vmem:[%s4718_s1 + $0x70] sm:$0xff] }
  0x8c   :  { %206 = vrot.lane.b32.xlu0 %v196_v30, %s3775_s17  ;;  %672 = vmatmul.bf16.vlgmr.msra.gmra.mxu0 %v2597_v53  ;;  %v3449_v30 = vld [vmem:[%s4718_s1 + $0x110] sm:$0xff]  ;;  %183 = vst.msk [vmem:[#allocation2 + $0x1c] sm:$0xf] %vm92_vm6, %v179_v47 }
  0x8d   :  { %v91_v44 = vpack.c.bf16 %v3642_v37, %v3642_v37  ;;  %v86_v45 = vsel %vm3877_vm2, %v3641_v38, 0.0  ;;  %v141_v14 = vpack.c.bf16 %v3667_v12, %v3667_v12  ;;  %v136_v17 = vsel %vm3877_vm2, %v3666_v13, 0.0  ;;  %745 = vmatpush.bf16.msrb.mxu0 %v3449_v30  ;;  %684 = vmatpush.bf16.msra.mxu1 %v3429_v34  ;;  %182 = vst.msk [vmem:[#allocation2 + $0x8] sm:$0xf] %vm92_vm6, %v178_v1  ;;  %v3481_v1 = vld [vmem:[%s4720_s3 + $0x60] sm:$0xff] }
  0x8e   :  { %v90_v51 = vpack.c.bf16 %v86_v45, %v86_v45  ;;  %v116_v54 = vpop.permute.xlu0 %115  ;;  %v140_v18 = vpack.c.bf16 %v136_v17, %v136_v17  ;;  %v3428_v45 = vld [vmem:[%s4718_s1 + $0x68] sm:$0xff] }
  0x8f   :  { %96 = vst.msk [vmem:[#allocation2 + $0x3c] sm:$0xf] %vm92_vm6, %v91_v44  ;;  %v3448_v44 = vld [vmem:[%s4718_s1 + $0x108] sm:$0xff] }
  0x90   :  { %95 = vst.msk [vmem:[#allocation2 + $0x28] sm:$0xf] %vm92_vm6, %v90_v51 }
  0x91   :  { %124 = vst.msk [vmem:[#allocation2 + $0x28] sm:$0xf] %vm121_vm7, %v114_v24  ;;  %v3436_v24 = vld [vmem:[%s4718_s1 + $0xa8] sm:$0xff]  ;;  %746 = vmatpush.bf16.msrb.mxu0 %v3448_v44  ;;  %685 = vmatpush.bf16.msra.mxu1 %v3428_v45  ;;  %v3743_v44 = vld [vmem:[%s4719_s2] ss:$0 sm:$0xff] }
  0x92   :  { %v3645_v55 = vpop.permute.xlu1 %3644  ;;  %125 = vst.msk [vmem:[#allocation2 + $0x3c] sm:$0xf] %vm121_vm7, %v116_v54  ;;  %704 = vmatpush.bf16.msra.mxu2 %v3436_v24  ;;  %v3426_v54 = vld [vmem:[%s4718_s1 + $0x58] sm:$0xff] }
  0x93   :  { %166 = vrot.lane.b32.xlu1 %v156_v48, %s3775_s17  ;;  %168 = vrot.lane.b32.xlu2 %v157_v41, %s3775_s17  ;;  %v3647_v56 = vunpack.i.h.bf16 %v3645_v55  ;;  %v3646_v58 = vunpack.i.l.bf16 %v3645_v55  ;;  %145 = vst.msk [vmem:[#allocation2 + $0x40] sm:$0xf] %vm92_vm6, %v141_v14  ;;  %v3447_v48 = vld [vmem:[%s4718_s1 + $0x100] sm:$0xff]  ;;  %v3432_v55 = vld [vmem:[%s4718_s1 + $0x88] sm:$0xff] }
  0x94   :  { %3669 = vrot.lane.b32.xlu0 %v3919_v43, %s3773_s15  ;;  %144 = vst.msk [vmem:[#allocation2 + $0x2c] sm:$0xf] %vm92_vm6, %v140_v18 }
  0x95   :  { %v247_v59 = vpack.c.bf16 %v3647_v56, %v3647_v56  ;;  %v244_v60 = vsel %vm3901_vm4, %v3646_v58, 0.0  ;;  %747 = vmatpush.bf16.msrb.mxu0 %v3447_v48  ;;  %686 = vmatpush.bf16.msra.mxu1 %v3427_v49  ;;  %v3431_v56 = vld [vmem:[%s4718_s1 + $0x80] sm:$0xff]  ;;  %v3424_v58 = vld [vmem:[%s4718_s1 + $0x48] sm:$0xff] }
  0x96   :  { %v248_v61 = vpack.c.bf16 %v244_v60, %v244_v60  ;;  %v270_v43 = vpop.permute.xlu0 %269  ;;  %705 = vmatpush.bf16.msra.mxu2 %v3435_v35  ;;  %v3423_v60 = vld [vmem:[%s4718_s1 + $0x40] sm:$0xff] }
  0x97   :  { %251 = vst.msk [vmem:[#allocation2 + $0xc] sm:$0xf] %vm92_vm6, %v247_v59  ;;  %v181_v59 = vpack.c.bf16 %v3842_v3, %v3842_v3 }
  0x98   :  { %279 = vst.msk [vmem:[#allocation2 + $0xc] sm:$0xf] %vm121_vm7, %v268_v62  ;;  %v2616_v8 = vld [vmem:[#allocation2 + $0x28] sm:$0xf]  ;;  %v180_v62 = vpack.c.bf16 %v3869_v16, %v3869_v16 }
  0x99   :  { %252 = vst.msk [vmem:[#allocation2 + $0x20] sm:$0xf] %vm92_vm6, %v248_v61  ;;  %v3412_v9 = vld [vmem:[#allocation2 + $0x38] sm:$0xf0]  ;;  %687 = vmatpush.bf16.msra.mxu1 %v3426_v54  ;;  %v3480_v54 = vld [vmem:[%s4720_s3 + $0x58] sm:$0xff] }
  0x9a   :  { %280 = vst.msk [vmem:[#allocation2 + $0x20] sm:$0xf] %vm121_vm7, %v270_v43  ;;  %v2617_v10 = vor.u32 %v3412_v9, %v2616_v8  ;;  %v3660_v26 = vpop.permute.xlu1 %3659  ;;  %706 = vmatpush.bf16.msra.mxu2 %v3434_v46  ;;  %v3482_v46 = vld [vmem:[%s4720_s3 + $0x68] sm:$0xff] }
  0x9b   :  { %v3662_v31 = vunpack.i.h.bf16 %v3660_v26  ;;  %v3661_v32 = vunpack.i.l.bf16 %v3660_v26  ;;  %185 = vst.msk [vmem:[#allocation2 + $0x44] sm:$0xf] %vm92_vm6, %v181_v59 }
  0x9c   :  { %677 = vmatmul.bf16.gmra.mxu0 %v2617_v10  ;;  %184 = vst.msk [vmem:[#allocation2 + $0x30] sm:$0xf] %vm92_vm6, %v180_v62 }
  0x9d   :  { %v249_v39 = vpack.c.bf16 %v3662_v31, %v3662_v31  ;;  %v246_v40 = vsel %vm3939_vm5, %v3661_v32, 0.0  ;;  %688 = vmatpush.bf16.msra.mxu1 %v3425_v0  ;;  %v3479_v0 = vld [vmem:[%s4720_s3 + $0x50] sm:$0xff] }
  0x9e   :  { %v3655_v21 = vpop.permute.xlu0 %3654  ;;  %v250_v42 = vpack.c.bf16 %v246_v40, %v246_v40  ;;  %707 = vmatpush.bf16.msra.mxu2 %v3433_v50 }
  0x9f   :  { %v3406_v25 = vld [vmem:[#allocation2 + $0xc] sm:$0xf]  ;;  %v3657_v27 = vunpack.i.h.bf16 %v3655_v21  ;;  %v3656_v28 = vunpack.i.l.bf16 %v3655_v21  ;;  %253 = vst.msk [vmem:[#allocation2 + $0x34] sm:$0xf] %vm92_vm6, %v249_v39 }
  0xa0   :  { %254 = vst.msk [vmem:[#allocation2 + $0x48] sm:$0xf] %vm92_vm6, %v250_v42  ;;  %v3483_v42 = vld [vmem:[%s4720_s3 + $0x70] sm:$0xff] }
  0xa1   :  { %v2606_v29 = vld [vmem:[#allocation2 + $0x1c] sm:$0xf0]  ;;  %v295_v37 = vpack.c.bf16 %v3657_v27, %v3657_v27  ;;  %v292_v38 = vsel %vm3901_vm4, %v3656_v28, 0.0  ;;  %689 = vmatpush.bf16.msra.mxu1 %v3424_v58 }
  0xa2   :  { %v2609_v33 = vor.u32 %v3406_v25, %v2606_v29  ;;  %v296_v41 = vpack.c.bf16 %v292_v38, %v292_v38  ;;  %708 = vmatpush.bf16.msra.mxu2 %v3432_v55 }
  0xa3   :  { %299 = vst.msk [vmem:[#allocation2 + $0x10] sm:$0xf] %vm92_vm6, %v295_v37 }
  0xa4   :  { %729 = vmatmul.bf16.vlgmr.msra.gmra.mxu3 %v2609_v33  ;;  %300 = vst.msk [vmem:[#allocation2 + $0x24] sm:$0xf] %vm92_vm6, %v296_v41  ;;  %v3484_v41 = vld [vmem:[%s4720_s3 + $0x78] sm:$0xff] }
  0xa5   :  { %690 = vmatpush.bf16.msra.mxu1 %v3423_v60 }
  0xa6   :  { %709 = vmatpush.bf16.msra.mxu2 %v3431_v56 }
  0xaa   :  { %v2612_v51 = vld [vmem:[#allocation2 + $0x10] sm:$0xf]  ;;  %1662 = vmatpush.bf16.msrb.mxu2 %v3484_v41 }
  0xab   :  { %v3409_v52 = vld [vmem:[#allocation2 + $0x20] sm:$0xf0] }
  0xac   :  { %v2613_v53 = vor.u32 %v3409_v52, %v2612_v51 }
  0xae   :  { %2778 = vmatmul.msk.bf16.vlgmr.msrb.gmra.mxu0 %vm657_vm8, %v2613_v53  ;;  %1663 = vmatpush.bf16.msrb.mxu2 %v3483_v42 }
  0xb2   :  { %1664 = vmatpush.bf16.msrb.mxu2 %v3482_v46 }
  0xb6   :  { %1665 = vmatpush.bf16.msrb.mxu2 %v3481_v1 }
  0xba   :  { %1666 = vmatpush.bf16.msrb.mxu2 %v3480_v54 }
  0xbe   :  { %1667 = vmatpush.bf16.msrb.mxu2 %v3479_v0 }
  0xdd   :  { %v165_v61 = vpop.permute.xlu2 %164 }
  0xde   :  { %175 = vst.msk [vmem:[#allocation2 + $0x18] sm:$0xf] %vm121_vm7, %v165_v61 }
  0xe5   :  { %v272_v43 = vpop.permute.xlu2 %271  ;;  %v2598_v13 = vld [vmem:[#allocation2 + $0x14] sm:$0xf0] }
  0xe6   :  { %281 = vst.msk [vmem:[#allocation2 + $0x34] sm:$0xf] %vm121_vm7, %v272_v43 }
  0xed   :  { %v205_v3 = vpop.permute.xlu1 %204  ;;  %v169_v63 = vpop.permute.xlu2 %168  ;;  %v3411_v10 = vld [vmem:[#allocation2 + $0x34] sm:$0xf] }
  0xee   :  { %215 = vst.msk [vmem:[#allocation2 + $0x1c] sm:$0xf] %vm121_vm7, %v205_v3  ;;  %v203_v4 = vpop.permute.xlu0 %202  ;;  %v3478_v3 = vld [vmem:[%s4720_s3 + $0x48] sm:$0xff] }
  0xef   :  { %177 = vst.msk [vmem:[#allocation2 + $0x40] sm:$0xf] %vm121_vm7, %v169_v63  ;;  %1668 = vmatpush.bf16.msrb.mxu2 %v3478_v3 }
  0xf0   :  { %214 = vst.msk [vmem:[#allocation2 + $0x8] sm:$0xf] %vm121_vm7, %v203_v4 }
  0xf5   :  { %v163_v5 = vpop.permute.xlu1 %162  ;;  %v3408_v6 = vld [vmem:[#allocation2 + $0x18] sm:$0xf0] }
  0xf6   :  { %174 = vst.msk [vmem:[#allocation2 + $0x4] sm:$0xf] %vm121_vm7, %v163_v5  ;;  %v274_v16 = vpop.permute.xlu0 %273  ;;  %v2618_v32 = vld [vmem:[#allocation2 + $0x3c] sm:$0xf0] }
  0xf7   :  { %282 = vst.msk [vmem:[#allocation2 + $0x48] sm:$0xf] %vm121_vm7, %v274_v16  ;;  %v2604_v8 = vld [vmem:[#allocation2 + $0x8] sm:$0xf]  ;;  %v3477_v16 = vld [vmem:[%s4720_s3 + $0x40] sm:$0xff] }
  0xf8   :  { %v2605_v9 = vor.u32 %v3408_v6, %v2604_v8  ;;  %1669 = vmatpush.bf16.msrb.mxu2 %v3477_v16 }
  0xfa   :  { %710 = vmatmul.bf16.vlgmr.msra.gmra.mxu2 %v2605_v9 }
  0xfd   :  { %v209_v11 = vpop.permute.xlu1 %208  ;;  %v3405_v12 = vld [vmem:[#allocation2 + $0x4] sm:$0xf] }
  0xfe   :  { %217 = vst.msk [vmem:[#allocation2 + $0x44] sm:$0xf] %vm121_vm7, %v209_v11  ;;  %v207_v14 = vpop.permute.xlu0 %206  ;;  %v2601_v17 = vor.u32 %v3405_v12, %v2598_v13  ;;  %v2626_v18 = vld [vmem:[#allocation2 + $0x44] sm:$0xf0] }
  0xff   :  { %216 = vst.msk [vmem:[#allocation2 + $0x30] sm:$0xf] %vm121_vm7, %v207_v14  ;;  %v2629_v19 = vor.u32 %v3411_v10, %v2626_v18 }
 0x100   :  { %691 = vmatmul.bf16.vlgmr.msra.gmra.mxu1 %v2601_v17 }
 0x101   :  { %734 = vmatmul.bf16.gmra.mxu3 %v2629_v19 }
 0x105   :  { %v167_v20 = vpop.permute.xlu1 %166  ;;  %v3413_v21 = vld [vmem:[#allocation2 + $0x40] sm:$0xf0] }
 0x106   :  { %176 = vst.msk [vmem:[#allocation2 + $0x2c] sm:$0xf] %vm121_vm7, %v167_v20  ;;  %v3670_v23 = vpop.permute.xlu0 %3669  ;;  %v2624_v24 = vld [vmem:[#allocation2 + $0x30] sm:$0xf] }
 0x107   :  { %v3672_v25 = vunpack.i.h.bf16 %v3670_v23  ;;  %v3671_v26 = vunpack.i.l.bf16 %v3670_v23  ;;  %v2625_v27 = vor.u32 %v3413_v21, %v2624_v24 }
 0x109   :  { %v297_v28 = vpack.c.bf16 %v3672_v25, %v3672_v25  ;;  %v294_v29 = vsel %vm3939_vm5, %v3671_v26, 0.0  ;;  %v673_v38 = vpop.f32.mrf.mxu0 }
 0x10a   :  { %v298_v30 = vpack.c.bf16 %v294_v29, %v294_v29  ;;  %715 = vmatmul.bf16.gmra.mxu2 %v2625_v27  ;;  %v674_v47 = vadd.f32 %v3743_v44, %v673_v38 }
 0x10b   :  { %301 = vst.msk [vmem:[#allocation2 + $0x38] sm:$0xf] %vm92_vm6, %v297_v28 }
 0x10c   :  { %302 = vst.msk [vmem:[#allocation2 + $0x4c] sm:$0xf] %vm92_vm6, %v298_v30 }
 0x10d   :  { %v3410_v31 = vld [vmem:[#allocation2 + $0x2c] sm:$0xf] }
 0x10e   :  { %v2621_v33 = vor.u32 %v3410_v31, %v2618_v32 }
 0x110   :  { %696 = vmatmul.bf16.gmra.mxu1 %v2621_v33 }
 0x111   :  { %v675_v39 = vpop.f32.mrf.mxu0 }
 0x112   :  { %v2632_v34 = vld [vmem:[#allocation2 + $0x38] sm:$0xf]  ;;  %v676_v56 = vadd.f32 %v3743_v44, %v675_v39 }
 0x113   :  { %v3414_v35 = vld [vmem:[#allocation2 + $0x48] sm:$0xf0] }
 0x114   :  { %v2633_v37 = vor.u32 %v3414_v35, %v2632_v34 }
 0x116   :  { %2779 = vmatmul.msk.bf16.gmra.mxu0 %vm657_vm8, %v2633_v37 }
 0x119   :  { %v678_v40 = vpop.f32.mrf.mxu0 }
 0x11a   :  { %v679_v8 = vadd.f32 %v3743_v44, %v678_v40 }
 0x121   :  { %v680_v45 = vpop.f32.mrf.mxu0 }
 0x122   :  { %v681_v29 = vadd.f32 %v3743_v44, %v680_v45 }
 0x127   :  { %v730_v48 = vpop.f32.mrf.mxu3 }
 0x12b   :  { %v749_v53 = vpop.f32.mrf.mxu0 }
 0x12f   :  { %v732_v43 = vpop.f32.mrf.mxu3 }
 0x133   :  { %v751_v6 = vpop.f32.mrf.mxu0 }
 0x17d   :  { %v711_v49 = vpop.f32.mrf.mxu2  ;;  %v692_v50 = vpop.f32.mrf.mxu1 }
 0x17e   :  { %v693_v51 = vadd.f32 %v692_v50, %v674_v47 }
 0x180   :  { %v712_v52 = vadd.f32 %v711_v49, %v693_v51 }
 0x182   :  { %v731_v55 = vadd.f32 %v730_v48, %v712_v52 }
 0x184   :  { %v750_v58 = vadd.f32 %v749_v53, %v731_v55  ;;  %v735_v14 = vpop.f32.mrf.mxu3 }
 0x185   :  { %v713_v59 = vpop.f32.mrf.mxu2  ;;  %v694_v60 = vpop.f32.mrf.mxu1 }
 0x186   :  { %v4138_v61 = vmax.f32 %v750_v58, 0.0  ;;  %v695_v62 = vadd.f32 %v694_v60, %v676_v56 }
 0x188   :  { %v855_v63 = vpack.c.bf16 %v4138_v61, %v4138_v61  ;;  %v714_v4 = vadd.f32 %v713_v59, %v695_v62  ;;  %v763_v20 = vrot.slane %v4138_v61, 7  ;;  %v883_v21 = vrot.slane %v4138_v61, 1 }
 0x18a   :  { %859 = vst [vmem:[#allocation3 + $0x10] sm:$0xf] %v855_v63  ;;  %v733_v5 = vadd.f32 %v732_v43, %v714_v4 }
 0x18c   :  { %v752_v9 = vadd.f32 %v751_v6, %v733_v5  ;;  %v737_v41 = vpop.f32.mrf.mxu3 }
 0x18d   :  { %v716_v10 = vpop.f32.mrf.mxu2  ;;  %v697_v11 = vpop.f32.mrf.mxu1 }
 0x18e   :  { %v4148_v12 = vmax.f32 %v752_v9, 0.0  ;;  %v698_v13 = vadd.f32 %v697_v11, %v679_v8 }
 0x190   :  { %v856_v17 = vpack.c.bf16 %v4148_v12, %v4148_v12  ;;  %v717_v18 = vadd.f32 %v716_v10, %v698_v13  ;;  %v764_v19 = vrot.slane %v4148_v12, 7  ;;  %v884_v23 = vrot.slane %v4148_v12, 1 }
 0x191   :  { %v3688_v16 = vpack.i.bf16 %v4148_v12, %v4138_v61 }
 0x192   :  { %860 = vst [vmem:[#allocation3 + $0x34] sm:$0xf] %v856_v17  ;;  %v736_v24 = vadd.f32 %v735_v14, %v717_v18  ;;  %v769_v25 = vsel %vm63_vm0, %v763_v20, %v764_v19  ;;  %v889_v28 = vsel %vm222_vm3, %v883_v21, %v884_v23  ;;  %v3476_v17 = vld [vmem:[%s4720_s3 + $0x38] sm:$0xff] }
 0x193   :  { %v754_v26 = vpop.f32.mrf.mxu0  ;;  %v802_v27 = vpack.c.bf16 %v769_v25, %v769_v25  ;;  %v919_v31 = vpack.c.bf16 %v889_v28, %v889_v28  ;;  %1643 = vmatpush.bf16.msrb.mxu1 %v3476_v17  ;;  %v3492_v18 = vld [vmem:[%s4720_s3 + $0xb8] sm:$0xff] }
 0x194   :  { %v755_v30 = vadd.f32 %v754_v26, %v736_v24  ;;  %1681 = vmatpush.bf16.msrb.mxu3 %v3492_v18  ;;  %v3500_v24 = vld [vmem:[%s4720_s3 + $0xf8] sm:$0xff]  ;;  %v3489_v26 = vld [vmem:[%s4720_s3 + $0xa0] sm:$0xff] }
 0x195   :  { %v699_v32 = vpop.f32.mrf.mxu1  ;;  %806 = vst [vmem:[#allocation3 + $0x28] sm:$0xf] %v802_v27  ;;  %v718_v35 = vpop.f32.mrf.mxu2  ;;  %1700 = vmatpush.bf16.msra.mxu0 %v3500_v24  ;;  %v3499_v27 = vld [vmem:[%s4720_s3 + $0xf0] sm:$0xff]  ;;  %v3521_v24 = vld [vmem:[%s4720_s3 + $0x1a0] sm:$0xff] }
 0x196   :  { %v761_v33 = vmax.f32 %v755_v30, 0.0  ;;  %v700_v34 = vadd.f32 %v699_v32, %v681_v29  ;;  %923 = vst [vmem:[#allocation3 + $0x1c] sm:$0xf] %v919_v31  ;;  %v4222_v29 = vand.u32 127, %v34_v2  ;;  %v3488_v30 = vld [vmem:[%s4720_s3 + $0x98] sm:$0xff]  ;;  %v3498_v31 = vld [vmem:[%s4720_s3 + $0xe8] sm:$0xff] }
 0x197   :  { %v3516_v32 = vld [vmem:[%s4720_s3 + $0x178] sm:$0xff] }
 0x198   :  { %v857_v37 = vpack.c.bf16 %v761_v33, %v761_v33  ;;  %v719_v38 = vadd.f32 %v718_v35, %v700_v34  ;;  %v765_v39 = vrot.slane %v761_v33, 7  ;;  %v885_v40 = vrot.slane %v761_v33, 1  ;;  %1738 = vmatpush.bf16.msra.mxu2 %v3516_v32  ;;  %v3487_v34 = vld [vmem:[%s4720_s3 + $0x90] sm:$0xff]  ;;  %v3497_v35 = vld [vmem:[%s4720_s3 + $0xe0] sm:$0xff] }
 0x199   :  { %1701 = vmatpush.bf16.msra.mxu0 %v3499_v27  ;;  %vm53_vm9 = vcmp.ge.s32.totalorder %v4222_v29, 8  ;;  %vm54_vm11 = vcmp.lt.s32.totalorder %v4222_v29, 120 }
 0x19a   :  { %861 = vst [vmem:[#allocation3 + $0x58] sm:$0xf] %v857_v37  ;;  %v738_v42 = vadd.f32 %v737_v41, %v719_v38  ;;  %v768_v46 = vsel %vm63_vm0, %v764_v19, %v765_v39  ;;  %v888_v44 = vsel %vm222_vm3, %v884_v23, %v885_v40  ;;  %v3475_v19 = vld [vmem:[%s4720_s3 + $0x30] sm:$0xff]  ;;  %v3490_v23 = vld [vmem:[%s4720_s3 + $0xa8] sm:$0xff]  ;;  %vm783_vm10 = vmand %vm3877_vm2, %vm53_vm9 }
 0x19b   :  { %v756_v45 = vpop.f32.mrf.mxu0  ;;  %v799_v47 = vsel %vm3877_vm2, %v768_v46, 0.0  ;;  %v916_v48 = vsel %vm3901_vm4, %v888_v44, 0.0  ;;  %v3708_v11 = vpack.i.bf16 %v888_v44, %v889_v28  ;;  %1644 = vmatpush.bf16.msrb.mxu1 %v3475_v19  ;;  %v3472_v28 = vld [vmem:[%s4720_s3 + $0x18] sm:$0xff]  ;;  %vm821_vm12 = vmand %vm3877_vm2, %vm54_vm11 }
 0x19c   :  { %v757_v49 = vadd.f32 %v756_v45, %v738_v42  ;;  %v803_v50 = vpack.c.bf16 %v799_v47, %v799_v47  ;;  %v920_v1 = vpack.c.bf16 %v916_v48, %v916_v48  ;;  %v2784_v9 = vld [vmem:[#allocation3 + $0x24] sm:$0xf0]  ;;  %v3470_v42 = vld [vmem:[%s4720_s3 + $0x8] sm:$0xff]  ;;  %v3496_v47 = vld [vmem:[%s4720_s3 + $0xd8] sm:$0xff] }
 0x19d   :  { %1702 = vmatpush.bf16.msra.mxu0 %v3498_v31  ;;  %v3486_v45 = vld [vmem:[%s4720_s3 + $0x88] sm:$0xff]  ;;  %vm900_vm13 = vmand %vm3901_vm4, %vm53_vm9  ;;  %v3531_v31 = vld [vmem:[%s4720_s3 + $0x1f0] sm:$0xff] }
 0x19e   :  { %v762_v51 = vmax.f32 %v757_v49, 0.0  ;;  %807 = vst [vmem:[#allocation3 + $0x4c] sm:$0xf] %v803_v50  ;;  %v3514_v48 = vld [vmem:[%s4720_s3 + $0x168] sm:$0xff]  ;;  %v3469_v50 = vld [vmem:[%s4720_s3] sm:$0xff]  ;;  %vm4329_vm14 = vmand %vm3939_vm5, %vm53_vm9 }
 0x19f   :  { %924 = vst [vmem:[#allocation3 + $0x40] sm:$0xf] %v920_v1  ;;  %v3485_v1 = vld [vmem:[%s4720_s3 + $0x80] sm:$0xff]  ;;  %vm4337_vm15 = vmand %vm3860_vm1, %vm54_vm11 }
 0x1a0   :  { %v858_v52 = vpack.c.bf16 %v762_v51, %v762_v51  ;;  %v766_v53 = vrot.slane %v762_v51, 7  ;;  %v886_v54 = vrot.slane %v762_v51, 1  ;;  %v3698_v6 = vpack.i.bf16 %v762_v51, %v761_v33  ;;  %v3471_v33 = vld [vmem:[%s4720_s3 + $0x10] sm:$0xff]  ;;  %vm938_vm2 = vmand %vm3939_vm5, %vm54_vm11 }
 0x1a1   :  { %1703 = vmatpush.bf16.msra.mxu0 %v3497_v35  ;;  %v3495_v51 = vld [vmem:[%s4720_s3 + $0xd0] sm:$0xff] }
 0x1a2   :  { %862 = vst [vmem:[#allocation3 + $0x7c] sm:$0xf] %v858_v52  ;;  %v767_v55 = vsel %vm63_vm0, %v765_v39, %v766_v53  ;;  %v770_v0 = vsel %vm63_vm0, %v766_v53, %v763_v20  ;;  %v887_v56 = vsel %vm222_vm3, %v885_v40, %v886_v54  ;;  %v890_v58 = vsel %vm222_vm3, %v886_v54, %v883_v21  ;;  %v3491_v20 = vld [vmem:[%s4720_s3 + $0xb0] sm:$0xff]  ;;  %v3474_v21 = vld [vmem:[%s4720_s3 + $0x28] sm:$0xff]  ;;  %v3508_v54 = vld [vmem:[%s4720_s3 + $0x138] sm:$0xff] }
 0x1a3   :  { %v804_v59 = vpack.c.bf16 %v767_v55, %v767_v55  ;;  %v3678_v60 = vpack.i.bf16 %v767_v55, %v768_v46  ;;  %v797_v62 = vsel %vm3860_vm1, %v770_v0, 0.0  ;;  %v3683_v43 = vpack.i.bf16 %v769_v25, %v770_v0  ;;  %1682 = vmatpush.bf16.msrb.mxu3 %v3491_v20  ;;  %1645 = vmatpush.bf16.msrb.mxu1 %v3474_v21  ;;  %v3473_v25 = vld [vmem:[%s4720_s3 + $0x20] sm:$0xff]  ;;  %v3515_v39 = vld [vmem:[%s4720_s3 + $0x170] sm:$0xff]  ;;  %vm4357_vm0 = vmand %vm3860_vm1, %vm53_vm9 }
 0x1a4   :  { %v801_v3 = vpack.c.bf16 %v797_v62, %v797_v62  ;;  %v921_v63 = vpack.c.bf16 %v887_v56, %v887_v56  ;;  %v918_v4 = vsel %vm3939_vm5, %v890_v58, 0.0  ;;  %v3723_v13 = vpack.i.bf16 %v890_v58, %v887_v56  ;;  %1739 = vmatpush.bf16.msra.mxu2 %v3515_v39  ;;  %v3524_v62 = vld [vmem:[%s4720_s3 + $0x1b8] sm:$0xff]  ;;  %v3505_v21 = vld [vmem:[%s4720_s3 + $0x120] sm:$0xff]  ;;  %vm936_vm1 = vmand %vm3901_vm4, %vm54_vm11 }
 0x1a5   :  { %808 = vst [vmem:[#allocation3 + $0x70] sm:$0xf] %v804_v59  ;;  %3679 = vrot.lane.b32.xlu2 %v3678_v60, %s3776_s21  ;;  %3684 = vrot.lane.b32.xlu0 %v3683_v43, %s3777_s22  ;;  %v922_v5 = vpack.c.bf16 %v918_v4, %v918_v4  ;;  %v3460_v61 = vld [vmem:[#allocation3 + $0x4c] sm:$0xf]  ;;  %v3494_v59 = vld [vmem:[%s4720_s3 + $0xc8] sm:$0xff]  ;;  %v3511_v4 = vld [vmem:[%s4720_s3 + $0x150] sm:$0xff] }
 0x1a6   :  { %805 = vst [vmem:[#allocation3 + $0x4] sm:$0xf] %v801_v3  ;;  %3674 = vrot.lane.b32.xlu1 %v3683_v43, %s3776_s21  ;;  %1704 = vmatpush.bf16.msra.mxu0 %v3496_v47  ;;  %v3507_v3 = vld [vmem:[%s4720_s3 + $0x130] sm:$0xff]  ;;  %vm2560_vm4 = vcmask 261120  }
 0x1a7   :  { %925 = vst [vmem:[#allocation3 + $0x64] sm:$0xf] %v921_v63  ;;  %1683 = vmatpush.bf16.msrb.mxu3 %v3490_v23  ;;  %1646 = vmatpush.bf16.msrb.mxu1 %v3473_v25  ;;  %v3493_v63 = vld [vmem:[%s4720_s3 + $0xc0] sm:$0xff] }
 0x1a8   :  { %926 = vst [vmem:[#allocation3 + $0x88] sm:$0xf] %v922_v5  ;;  %1740 = vmatpush.bf16.msra.mxu2 %v3514_v48  ;;  %v3509_v23 = vld [vmem:[%s4720_s3 + $0x140] sm:$0xff] }
 0x1aa   :  { %1705 = vmatpush.bf16.msra.mxu0 %v3495_v51 }
 0x1ab   :  { %1684 = vmatpush.bf16.msrb.mxu3 %v3489_v26  ;;  %1647 = vmatpush.bf16.msrb.mxu1 %v3472_v28 }
 0x1ac   :  { %v2820_v14 = vld [vmem:[#allocation3 + $0x6c] sm:$0xf0]  ;;  %1741 = vmatpush.bf16.msra.mxu2 %v3513_v22 }
 0x1ad   :  { %3694 = vrot.lane.b32.xlu2 %v3678_v60, %s3777_s22  ;;  %3699 = vrot.lane.b32.xlu0 %v3698_v6, %s3776_s21  ;;  %v3451_v8 = vld [vmem:[#allocation3 + $0x4] sm:$0xf]  ;;  %v2823_v12 = vor.u32 %v3460_v61, %v2820_v14  ;;  %v3510_v14 = vld [vmem:[%s4720_s3 + $0x148] sm:$0xff] }
 0x1ae   :  { %3689 = vrot.lane.b32.xlu1 %v3688_v16, %s3776_s21  ;;  %v2787_v10 = vor.u32 %v3451_v8, %v2784_v9  ;;  %v3512_v60 = vld [vmem:[%s4720_s3 + $0x158] sm:$0xff]  ;;  %1706 = vmatpush.bf16.msra.mxu0 %v3494_v59  ;;  %v3506_v8 = vld [vmem:[%s4720_s3 + $0x128] sm:$0xff] }
 0x1af   :  { %1685 = vmatpush.bf16.msrb.mxu3 %v3488_v30  ;;  %1648 = vmatpush.bf16.msrb.mxu1 %v3471_v33  ;;  %v3522_v61 = vld [vmem:[%s4720_s3 + $0x1a8] sm:$0xff] }
 0x1b0   :  { %1670 = vmatmul.bf16.vlgmr.msrb.gmra.mxu2 %v2787_v10  ;;  %v3502_v59 = vld [vmem:[%s4720_s3 + $0x108] sm:$0xff] }
 0x1b1   :  { %1742 = vmatpush.bf16.msra.mxu2 %v3512_v60 }
 0x1b2   :  { %1707 = vmatpush.bf16.msra.mxu0 %v3493_v63  ;;  %v3518_v63 = vld [vmem:[%s4720_s3 + $0x188] sm:$0xff] }
 0x1b3   :  { %1686 = vmatpush.bf16.msrb.mxu3 %v3487_v34  ;;  %1649 = vmatpush.bf16.msrb.mxu1 %v3470_v42  ;;  %v3520_v42 = vld [vmem:[%s4720_s3 + $0x198] sm:$0xff] }
 0x1b5   :  { %3709 = vrot.lane.b32.xlu2 %v3708_v11, %s3776_s21  ;;  %3714 = vrot.lane.b32.xlu0 %v3708_v11, %s3777_s22 }
 0x1b6   :  { %3704 = vrot.lane.b32.xlu1 %v3688_v16, %s3777_s22  ;;  %v3523_v16 = vld [vmem:[%s4720_s3 + $0x1b0] sm:$0xff]  ;;  %1743 = vmatpush.bf16.msra.mxu2 %v3511_v4  ;;  %v3528_v4 = vld [vmem:[%s4720_s3 + $0x1d8] sm:$0xff] }
 0x1b7   :  { %1687 = vmatpush.bf16.msrb.mxu3 %v3486_v45  ;;  %1650 = vmatpush.bf16.msrb.mxu1 %v3469_v50 }
 0x1ba   :  { %1744 = vmatpush.bf16.msra.mxu2 %v3510_v14 }
 0x1bb   :  { %1688 = vmatpush.bf16.msrb.mxu3 %v3485_v1  ;;  %1719 = vmatpush.bf16.msra.mxu1 %v3508_v54  ;;  %v3529_v1 = vld [vmem:[%s4720_s3 + $0x1e0] sm:$0xff] }
 0x1bd   :  { %3724 = vrot.lane.b32.xlu2 %v3723_v13, %s3776_s21  ;;  %3729 = vrot.lane.b32.xlu0 %v3723_v13, %s3777_s22 }
 0x1be   :  { %3719 = vrot.lane.b32.xlu1 %v3698_v6, %s3777_s22  ;;  %1745 = vmatpush.bf16.msra.mxu2 %v3509_v23 }
 0x1bf   :  { %1757 = vmatpush.bf16.msra.mxu3 %v3524_v62  ;;  %1720 = vmatpush.bf16.msra.mxu1 %v3507_v3 }
 0x1c0   :  { %1675 = vmatmul.bf16.gmra.mxu2 %v2823_v12  ;;  %v3532_v12 = vld [vmem:[%s4720_s3 + $0x1f8] sm:$0xff] }
 0x1c1   :  { %1776 = vmatpush.bf16.msrb.mxu0 %v3532_v12 }
 0x1c3   :  { %1758 = vmatpush.bf16.msra.mxu3 %v3523_v16  ;;  %1721 = vmatpush.bf16.msra.mxu1 %v3506_v8  ;;  %v3501_v16 = vld [vmem:[%s4720_s3 + $0x100] sm:$0xff] }
 0x1c5   :  { %1777 = vmatpush.bf16.msrb.mxu0 %v3531_v31  ;;  %v3526_v31 = vld [vmem:[%s4720_s3 + $0x1c8] sm:$0xff] }
 0x1c7   :  { %1759 = vmatpush.bf16.msra.mxu3 %v3522_v61  ;;  %1722 = vmatpush.bf16.msra.mxu1 %v3505_v21 }
 0x1cb   :  { %1760 = vmatpush.bf16.msra.mxu3 %v3521_v24 }
 0x1cf   :  { %1761 = vmatpush.bf16.msra.mxu3 %v3520_v42 }
 0x1ff   :  { %v3680_v2 = vpop.permute.xlu2 %3679 }
 0x200   :  { %v3682_v37 = vunpack.i.h.bf16 %v3680_v2  ;;  %v3681_v38 = vunpack.i.l.bf16 %v3680_v2 }
 0x202   :  { %v788_v40 = vsel %vm53_vm9, %v3682_v37, 0.0  ;;  %v787_v41 = vsel %vm783_vm10, %v3681_v38, 0.0 }
 0x203   :  { %v792_v46 = vpack.c.bf16 %v788_v40, %v788_v40  ;;  %v791_v44 = vpack.c.bf16 %v787_v41, %v787_v41  ;;  %v3504_v41 = vld [vmem:[%s4720_s3 + $0x118] sm:$0xff] }
 0x204   :  { %1723 = vmatpush.bf16.msra.mxu1 %v3504_v41 }
 0x205   :  { %796 = vst [vmem:[#allocation3 + $0x6c] sm:$0xf] %v792_v46  ;;  %v3530_v46 = vld [vmem:[%s4720_s3 + $0x1e8] sm:$0xff] }
 0x206   :  { %795 = vst [vmem:[#allocation3 + $0x48] sm:$0xf] %v791_v44  ;;  %1778 = vmatpush.bf16.msrb.mxu0 %v3530_v46 }
 0x207   :  { %v3695_v49 = vpop.permute.xlu2 %3694 }
 0x208   :  { %v3697_v52 = vunpack.i.h.bf16 %v3695_v49  ;;  %v3696_v53 = vunpack.i.l.bf16 %v3695_v49  ;;  %v3503_v49 = vld [vmem:[%s4720_s3 + $0x110] sm:$0xff] }
 0x209   :  { %1724 = vmatpush.bf16.msra.mxu1 %v3503_v49 }
 0x20a   :  { %v826_v55 = vsel %vm54_vm11, %v3697_v52, 0.0  ;;  %v825_v0 = vsel %vm821_vm12, %v3696_v53, 0.0  ;;  %v3519_v52 = vld [vmem:[%s4720_s3 + $0x190] sm:$0xff]  ;;  %1779 = vmatpush.bf16.msrb.mxu0 %v3529_v1 }
 0x20b   :  { %v830_v56 = vpack.c.bf16 %v826_v55, %v826_v55  ;;  %v829_v58 = vpack.c.bf16 %v825_v0, %v825_v0  ;;  %1762 = vmatpush.bf16.msra.mxu3 %v3519_v52 }
 0x20d   :  { %834 = vst [vmem:[#allocation3 + $0x74] sm:$0xf] %v830_v56  ;;  %1725 = vmatpush.bf16.msra.mxu1 %v3502_v59 }
 0x20e   :  { %833 = vst [vmem:[#allocation3 + $0x50] sm:$0xf] %v829_v58  ;;  %1780 = vmatpush.bf16.msrb.mxu0 %v3528_v4  ;;  %v3534_v4 = vld [vmem:[%s4720_s3 + $0x208] sm:$0xff] }
 0x20f   :  { %v3710_v43 = vpop.permute.xlu2 %3709  ;;  %1763 = vmatpush.bf16.msra.mxu3 %v3518_v63 }
 0x210   :  { %v3712_v5 = vunpack.i.h.bf16 %v3710_v43  ;;  %v3711_v6 = vunpack.i.l.bf16 %v3710_v43 }
 0x211   :  { %1726 = vmatpush.bf16.msra.mxu1 %v3501_v16 }
 0x212   :  { %v904_v9 = vsel %vm900_vm13, %v3712_v5, 0.0  ;;  %v903_v10 = vsel %vm53_vm9, %v3711_v6, 0.0 }
 0x213   :  { %v908_v11 = vpack.c.bf16 %v904_v9, %v904_v9  ;;  %v907_v13 = vpack.c.bf16 %v903_v10, %v903_v10  ;;  %v3527_v9 = vld [vmem:[%s4720_s3 + $0x1d0] sm:$0xff] }
 0x214   :  { %1781 = vmatpush.bf16.msrb.mxu0 %v3527_v9  ;;  %v3465_v52 = vld [vmem:[#allocation3 + $0x70] sm:$0xf0]  ;;  %v3533_v9 = vld [vmem:[%s4720_s3 + $0x200] sm:$0xff] }
 0x215   :  { %912 = vst [vmem:[#allocation3 + $0x3c] sm:$0xf] %v908_v11 }
 0x216   :  { %911 = vst [vmem:[#allocation3 + $0x18] sm:$0xf] %v907_v13  ;;  %v3517_v13 = vld [vmem:[%s4720_s3 + $0x180] sm:$0xff] }
 0x217   :  { %v3725_v19 = vpop.permute.xlu2 %3724  ;;  %v3685_v20 = vpop.permute.xlu0 %3684  ;;  %1764 = vmatpush.bf16.msra.mxu3 %v3517_v13 }
 0x218   :  { %v3727_v25 = vunpack.i.h.bf16 %v3725_v19  ;;  %v3726_v26 = vunpack.i.l.bf16 %v3725_v19  ;;  %v3687_v27 = vunpack.i.h.bf16 %v3685_v20  ;;  %v3686_v28 = vunpack.i.l.bf16 %v3685_v20  ;;  %v3675_v30 = vpop.permute.xlu1 %3674  ;;  %1782 = vmatpush.bf16.msrb.mxu0 %v3526_v31 }
 0x219   :  { %v3677_v2 = vunpack.i.h.bf16 %v3675_v30  ;;  %v3676_v33 = vunpack.i.l.bf16 %v3675_v30  ;;  %v3540_v30 = vld [vmem:[%s4720_s3 + $0x238] sm:$0xff] }
 0x21a   :  { %v906_v34 = vsel %vm4329_vm14, %v3727_v25, 0.0  ;;  %v905_v35 = vsel %vm53_vm9, %v3726_v26, 0.0  ;;  %v824_v37 = vsel %vm54_vm11, %v3687_v27, 0.0  ;;  %v823_v38 = vsel %vm4337_vm15, %v3686_v28, 0.0 }
 0x21b   :  { %v910_v15 = vpack.c.bf16 %v906_v34, %v906_v34  ;;  %v909_v39 = vpack.c.bf16 %v905_v35, %v905_v35  ;;  %v828_v40 = vpack.c.bf16 %v824_v37, %v824_v37  ;;  %v827_v44 = vpack.c.bf16 %v823_v38, %v823_v38  ;;  %v3525_v38 = vld [vmem:[%s4720_s3 + $0x1c0] sm:$0xff] }
 0x21c   :  { %v786_v45 = vsel %vm53_vm9, %v3677_v2, 0.0  ;;  %v785_v47 = vsel %vm4357_vm0, %v3676_v33, 0.0  ;;  %v3539_v33 = vld [vmem:[%s4720_s3 + $0x230] sm:$0xff]  ;;  %1783 = vmatpush.bf16.msrb.mxu0 %v3525_v38 }
 0x21d   :  { %914 = vst [vmem:[#allocation3 + $0x84] sm:$0xf] %v910_v15  ;;  %v790_v48 = vpack.c.bf16 %v786_v45, %v786_v45  ;;  %v789_v50 = vpack.c.bf16 %v785_v47, %v785_v47 }
 0x21e   :  { %913 = vst [vmem:[#allocation3 + $0x60] sm:$0xf] %v909_v39 }
 0x21f   :  { %832 = vst [vmem:[#allocation3 + $0x2c] sm:$0xf] %v828_v40  ;;  %v3700_v51 = vpop.permute.xlu0 %3699 }
 0x220   :  { %831 = vst [vmem:[#allocation3 + $0x8] sm:$0xf] %v827_v44  ;;  %v3702_v53 = vunpack.i.h.bf16 %v3700_v51  ;;  %v3701_v22 = vunpack.i.l.bf16 %v3700_v51  ;;  %v3690_v54 = vpop.permute.xlu1 %3689 }
 0x221   :  { %794 = vst [vmem:[#allocation3 + $0x24] sm:$0xf] %v790_v48  ;;  %v3692_v55 = vunpack.i.h.bf16 %v3690_v54  ;;  %v3691_v0 = vunpack.i.l.bf16 %v3690_v54  ;;  %v3464_v54 = vld [vmem:[#allocation3 + $0x68] sm:$0xf0] }
 0x222   :  { %793 = vst [vmem:[#allocation3] sm:$0xf] %v789_v50  ;;  %v846_v56 = vsel %vm53_vm9, %v3702_v53, 0.0  ;;  %v845_v58 = vsel %vm53_vm9, %v3701_v22, 0.0  ;;  %v2826_v53 = vld [vmem:[#allocation3 + $0x50] sm:$0xf] }
 0x223   :  { %v850_v60 = vpack.c.bf16 %v846_v56, %v846_v56  ;;  %v849_v62 = vpack.c.bf16 %v845_v58, %v845_v58  ;;  %v844_v43 = vsel %vm53_vm9, %v3692_v55, 0.0  ;;  %v843_v3 = vsel %vm53_vm9, %v3691_v0, 0.0  ;;  %v3537_v22 = vld [vmem:[%s4720_s3 + $0x220] sm:$0xff] }
 0x224   :  { %v848_v5 = vpack.c.bf16 %v844_v43, %v844_v43  ;;  %v847_v6 = vpack.c.bf16 %v843_v3, %v843_v3  ;;  %v2818_v0 = vld [vmem:[#allocation3 + $0x48] sm:$0xf]  ;;  %v2827_v29 = vor.u32 %v3465_v52, %v2826_v53  ;;  %v3535_v3 = vld [vmem:[%s4720_s3 + $0x210] sm:$0xff] }
 0x225   :  { %854 = vst [vmem:[#allocation3 + $0x78] sm:$0xf] %v850_v60  ;;  %v2819_v59 = vor.u32 %v3464_v54, %v2818_v0  ;;  %v3536_v60 = vld [vmem:[%s4720_s3 + $0x218] sm:$0xff] }
 0x226   :  { %853 = vst [vmem:[#allocation3 + $0x54] sm:$0xf] %v849_v62  ;;  %v3456_v8 = vld [vmem:[#allocation3 + $0x28] sm:$0xf0] }
 0x227   :  { %852 = vst [vmem:[#allocation3 + $0x30] sm:$0xf] %v848_v5  ;;  %v3715_v10 = vpop.permute.xlu0 %3714  ;;  %v2790_v11 = vld [vmem:[#allocation3 + $0x8] sm:$0xf]  ;;  %v2806_v5 = vld [vmem:[#allocation3 + $0x18] sm:$0xf] }
 0x228   :  { %851 = vst [vmem:[#allocation3 + $0xc] sm:$0xf] %v847_v6  ;;  %v3717_v14 = vunpack.i.h.bf16 %v3715_v10  ;;  %v3716_v61 = vunpack.i.l.bf16 %v3715_v10  ;;  %v2791_v12 = vor.u32 %v3456_v8, %v2790_v11  ;;  %v3705_v17 = vpop.permute.xlu1 %3704  ;;  %v3455_v18 = vld [vmem:[#allocation3 + $0x20] sm:$0xf0]  ;;  %v3458_v6 = vld [vmem:[#allocation3 + $0x38] sm:$0xf0] }
 0x229   :  { %v3707_v19 = vunpack.i.h.bf16 %v3705_v17  ;;  %v3706_v20 = vunpack.i.l.bf16 %v3705_v17  ;;  %v2782_v21 = vld [vmem:[#allocation3] sm:$0xf]  ;;  %v3457_v10 = vld [vmem:[#allocation3 + $0x30] sm:$0xf0]  ;;  %v2807_v13 = vor.u32 %v3458_v6, %v2806_v5  ;;  %v3454_v17 = vld [vmem:[#allocation3 + $0x1c] sm:$0xf] }
 0x22a   :  { %v940_v23 = vsel %vm936_vm1, %v3717_v14, 0.0  ;;  %v939_v36 = vsel %vm54_vm11, %v3716_v61, 0.0  ;;  %1689 = vmatmul.bf16.vlgmr.msrb.gmra.mxu3 %v2791_v12  ;;  %v2783_v24 = vor.u32 %v3455_v18, %v2782_v21  ;;  %v2798_v14 = vld [vmem:[#allocation3 + $0x10] sm:$0xf]  ;;  %v2808_v12 = vld [vmem:[#allocation3 + $0x3c] sm:$0xf0] }
 0x22b   :  { %v944_v25 = vpack.c.bf16 %v940_v23, %v940_v23  ;;  %v943_v26 = vpack.c.bf16 %v939_v36, %v939_v36  ;;  %v872_v27 = vsel %vm54_vm11, %v3707_v19, 0.0  ;;  %v871_v28 = vsel %vm54_vm11, %v3706_v20, 0.0  ;;  %v2842_v19 = vld [vmem:[#allocation3 + $0x60] sm:$0xf]  ;;  %v3467_v20 = vld [vmem:[#allocation3 + $0x80] sm:$0xf0] }
 0x22c   :  { %v876_v32 = vpack.c.bf16 %v872_v27, %v872_v27  ;;  %v875_v2 = vpack.c.bf16 %v871_v28, %v871_v28  ;;  %1651 = vmatmul.bf16.vlgmr.msrb.gmra.mxu1 %v2783_v24  ;;  %v2828_v43 = vld [vmem:[#allocation3 + $0x74] sm:$0xf0]  ;;  %v2799_v61 = vor.u32 %v3457_v10, %v2798_v14  ;;  %v2811_v18 = vor.u32 %v3454_v17, %v2808_v12  ;;  %v3466_v21 = vld [vmem:[#allocation3 + $0x78] sm:$0xf0]  ;;  %v3548_v17 = vld [vmem:[%s4722_s5 + $0x38] sm:$0xff] }
 0x22d   :  { %948 = vst [vmem:[#allocation3 + $0x44] sm:$0xf] %v944_v25  ;;  %1795 = vmatpush.bf16.msrb.mxu1 %v3540_v30  ;;  %v3461_v62 = vld [vmem:[#allocation3 + $0x54] sm:$0xf]  ;;  %v2843_v23 = vor.u32 %v3467_v20, %v2842_v19  ;;  %v2834_v36 = vld [vmem:[#allocation3 + $0x58] sm:$0xf]  ;;  %2434 = vmatpush.bf16.msrb.mxu2 %v3548_v17 }
 0x22e   :  { %947 = vst [vmem:[#allocation3 + $0x20] sm:$0xf] %v943_v26  ;;  %v2792_v34 = vld [vmem:[#allocation3 + $0x2c] sm:$0xf0]  ;;  %v2831_v63 = vor.u32 %v3461_v62, %v2828_v43  ;;  %v2835_v24 = vor.u32 %v3466_v21, %v2834_v36  ;;  %v3463_v25 = vld [vmem:[#allocation3 + $0x64] sm:$0xf] }
 0x22f   :  { %880 = vst [vmem:[#allocation3 + $0x38] sm:$0xf] %v876_v32  ;;  %v3730_v35 = vpop.permute.xlu0 %3729  ;;  %v3452_v37 = vld [vmem:[#allocation3 + $0xc] sm:$0xf]  ;;  %v2844_v26 = vld [vmem:[#allocation3 + $0x84] sm:$0xf0] }
 0x230   :  { %879 = vst [vmem:[#allocation3 + $0x14] sm:$0xf] %v875_v2  ;;  %v3732_v15 = vunpack.i.h.bf16 %v3730_v35  ;;  %v3731_v39 = vunpack.i.l.bf16 %v3730_v35  ;;  %v3720_v40 = vpop.permute.xlu1 %3719  ;;  %v2795_v41 = vor.u32 %v3452_v37, %v2792_v34  ;;  %v2847_v27 = vor.u32 %v3463_v25, %v2844_v26  ;;  %v3564_v19 = vld [vmem:[%s4722_s5 + $0xb8] sm:$0xff] }
 0x231   :  { %v3722_v42 = vunpack.i.h.bf16 %v3720_v40  ;;  %v3721_v46 = vunpack.i.l.bf16 %v3720_v40  ;;  %1796 = vmatpush.bf16.msrb.mxu1 %v3539_v33  ;;  %v3568_v17 = vld [vmem:[%s4722_s5 + $0xd8] sm:$0xff] }
 0x232   :  { %v942_v44 = vsel %vm938_vm2, %v3732_v15, 0.0  ;;  %v941_v45 = vsel %vm54_vm11, %v3731_v39, 0.0  ;;  %1708 = vmatmul.bf16.vlgmr.msra.gmra.mxu0 %v2795_v41 }
 0x233   :  { %v946_v47 = vpack.c.bf16 %v942_v44, %v942_v44  ;;  %v945_v48 = vpack.c.bf16 %v941_v45, %v941_v45  ;;  %v874_v49 = vsel %vm54_vm11, %v3722_v42, 0.0  ;;  %v873_v50 = vsel %vm54_vm11, %v3721_v46, 0.0  ;;  %v1671_v38 = vpop.f32.mrf.mxu2  ;;  %2460 = vmatpush.bf16.msra.mxu0 %v3564_v19  ;;  %v3551_v19 = vld [vmem:[%s4722_s5 + $0x50] sm:$0xff] }
 0x234   :  { %v878_v1 = vpack.c.bf16 %v874_v49, %v874_v49  ;;  %v877_v51 = vpack.c.bf16 %v873_v50, %v873_v50  ;;  %v3459_v30 = vld [vmem:[#allocation3 + $0x40] sm:$0xf0] }
 0x235   :  { %950 = vst [vmem:[#allocation3 + $0x8c] sm:$0xf] %v946_v47  ;;  %1797 = vmatpush.bf16.msrb.mxu1 %v3538_v57  ;;  %v2814_v28 = vld [vmem:[#allocation3 + $0x20] sm:$0xf] }
 0x236   :  { %949 = vst [vmem:[#allocation3 + $0x68] sm:$0xf] %v945_v48  ;;  %v2800_v55 = vld [vmem:[#allocation3 + $0x34] sm:$0xf0]  ;;  %v2815_v31 = vor.u32 %v3459_v30, %v2814_v28 }
 0x237   :  { %882 = vst [vmem:[#allocation3 + $0x80] sm:$0xf] %v878_v1  ;;  %v3453_v56 = vld [vmem:[#allocation3 + $0x14] sm:$0xf]  ;;  %2461 = vmatpush.bf16.msra.mxu0 %v3563_v7 }
 0x238   :  { %881 = vst [vmem:[#allocation3 + $0x5c] sm:$0xf] %v877_v51  ;;  %v2803_v58 = vor.u32 %v3453_v56, %v2800_v55  ;;  %v3744_v51 = vld [vmem:[%s4721_s4] ss:$0 sm:$0xff] }
 0x239   :  { %1798 = vmatpush.bf16.msrb.mxu1 %v3537_v22 }
 0x23a   :  { %1694 = vmatmul.bf16.gmra.mxu3 %v2827_v29  ;;  %1746 = vmatmul.bf16.vlgmr.msra.gmra.mxu2 %v2803_v58 }
 0x23b   :  { %v1673_v41 = vpop.f32.mrf.mxu2 }
 0x23c   :  { %1656 = vmatmul.bf16.gmra.mxu1 %v2819_v59  ;;  %v3468_v2 = vld [vmem:[#allocation3 + $0x88] sm:$0xf0] }
 0x23d   :  { %1799 = vmatpush.bf16.msrb.mxu1 %v3536_v60  ;;  %v2850_v32 = vld [vmem:[#allocation3 + $0x68] sm:$0xf] }
 0x23e   :  { %v2836_v8 = vld [vmem:[#allocation3 + $0x7c] sm:$0xf0]  ;;  %v2851_v33 = vor.u32 %v3468_v2, %v2850_v32 }
 0x23f   :  { %v3462_v16 = vld [vmem:[#allocation3 + $0x5c] sm:$0xf] }
 0x240   :  { %v2839_v11 = vor.u32 %v3462_v16, %v2836_v8 }
 0x241   :  { %1800 = vmatpush.bf16.msrb.mxu1 %v3535_v3 }
 0x242   :  { %1713 = vmatmul.bf16.gmra.mxu0 %v2831_v63 }
 0x243   :  { %v1676_v45 = vpop.f32.mrf.mxu2 }
 0x245   :  { %1801 = vmatpush.bf16.msrb.mxu1 %v3534_v4 }
 0x249   :  { %1802 = vmatpush.bf16.msrb.mxu1 %v3533_v9 }
 0x24a   :  { %1751 = vmatmul.bf16.gmra.mxu2 %v2839_v11  ;;  %1765 = vmatmul.bf16.vlgmr.msra.gmra.mxu3 %v2807_v13 }
 0x24b   :  { %v1678_v50 = vpop.f32.mrf.mxu2 }
 0x24c   :  { %1727 = vmatmul.bf16.vlgmr.msra.gmra.mxu1 %v2799_v61 }
 0x252   :  { %1784 = vmatmul.bf16.vlgmr.msrb.gmra.mxu0 %v2811_v18  ;;  %v3556_v18 = vld [vmem:[%s4722_s5 + $0x78] sm:$0xff] }
 0x253   :  { %2447 = vmatpush.bf16.msrb.mxu3 %v3556_v18  ;;  %v3543_v18 = vld [vmem:[%s4722_s5 + $0x10] sm:$0xff] }
 0x25a   :  { %1770 = vmatmul.bf16.gmra.mxu3 %v2843_v23 }
 0x25c   :  { %1732 = vmatmul.bf16.gmra.mxu1 %v2835_v24  ;;  %v3572_v24 = vld [vmem:[%s4722_s5 + $0xf8] sm:$0xff] }
 0x25d   :  { %2473 = vmatpush.bf16.msra.mxu1 %v3572_v24  ;;  %v3558_v24 = vld [vmem:[%s4722_s5 + $0x88] sm:$0xff] }
 0x262   :  { %1789 = vmatmul.bf16.gmra.mxu0 %v2847_v27 }
 0x26c   :  { %1803 = vmatmul.bf16.vlgmr.msrb.gmra.mxu1 %v2815_v31 }
 0x27c   :  { %1808 = vmatmul.bf16.gmra.mxu1 %v2851_v33 }
 0x2a9   :  { %v1652_v34 = vpop.f32.mrf.mxu1 }
 0x2aa   :  { %v1653_v55 = vadd.f32 %v3744_v51, %v1652_v34 }
 0x2ac   :  { %v1672_v29 = vadd.f32 %v1671_v38, %v1653_v55 }
 0x2ad   :  { %v1690_v37 = vpop.f32.mrf.mxu3 }
 0x2ae   :  { %v1691_v60 = vadd.f32 %v1690_v37, %v1672_v29 }
 0x2af   :  { %v1709_v15 = vpop.f32.mrf.mxu0 }
 0x2b0   :  { %v1710_v4 = vadd.f32 %v1709_v15, %v1691_v60 }
 0x2b1   :  { %v1654_v35 = vpop.f32.mrf.mxu1 }
 0x2b2   :  { %v1655_v53 = vadd.f32 %v3744_v51, %v1654_v35 }
 0x2b4   :  { %v1674_v0 = vadd.f32 %v1673_v41, %v1655_v53 }
 0x2b5   :  { %v1692_v40 = vpop.f32.mrf.mxu3 }
 0x2b6   :  { %v1693_v58 = vadd.f32 %v1692_v40, %v1674_v0 }
 0x2b7   :  { %v1711_v42 = vpop.f32.mrf.mxu0 }
 0x2b8   :  { %v1712_v43 = vadd.f32 %v1711_v42, %v1693_v58 }
 0x2b9   :  { %v1657_v39 = vpop.f32.mrf.mxu1 }
 0x2ba   :  { %v1658_v62 = vadd.f32 %v3744_v51, %v1657_v39 }
 0x2bc   :  { %v1677_v5 = vadd.f32 %v1676_v45, %v1658_v62 }
 0x2bd   :  { %v1695_v44 = vpop.f32.mrf.mxu3  ;;  %v1747_v22 = vpop.f32.mrf.mxu2 }
 0x2be   :  { %v1696_v16 = vadd.f32 %v1695_v44, %v1677_v5  ;;  %v3546_v5 = vld [vmem:[%s4722_s5 + $0x28] sm:$0xff] }
 0x2bf   :  { %v1714_v47 = vpop.f32.mrf.mxu0 }
 0x2c0   :  { %v1715_v14 = vadd.f32 %v1714_v47, %v1696_v16  ;;  %v3562_v16 = vld [vmem:[%s4722_s5 + $0xa8] sm:$0xff] }
 0x2c1   :  { %v1659_v46 = vpop.f32.mrf.mxu1  ;;  %2462 = vmatpush.bf16.msra.mxu0 %v3562_v16 }
 0x2c2   :  { %v1660_v11 = vadd.f32 %v3744_v51, %v1659_v46 }
 0x2c4   :  { %v1679_v20 = vadd.f32 %v1678_v50, %v1660_v11  ;;  %v3561_v11 = vld [vmem:[%s4722_s5 + $0xa0] sm:$0xff] }
 0x2c5   :  { %v1697_v48 = vpop.f32.mrf.mxu3  ;;  %v1749_v3 = vpop.f32.mrf.mxu2  ;;  %2463 = vmatpush.bf16.msra.mxu0 %v3561_v11 }
 0x2c6   :  { %v1698_v26 = vadd.f32 %v1697_v48, %v1679_v20  ;;  %v3559_v20 = vld [vmem:[%s4722_s5 + $0x90] sm:$0xff] }
 0x2c7   :  { %v1716_v1 = vpop.f32.mrf.mxu0 }
 0x2c8   :  { %v1717_v33 = vadd.f32 %v1716_v1, %v1698_v26  ;;  %v3541_v26 = vld [vmem:[%s4722_s5] sm:$0xff] }
 0x2c9   :  { %v1728_v57 = vpop.f32.mrf.mxu1 }
 0x2ca   :  { %v1729_v8 = vadd.f32 %v1728_v57, %v1710_v4  ;;  %v3571_v4 = vld [vmem:[%s4722_s5 + $0xf0] sm:$0xff] }
 0x2cb   :  { %2474 = vmatpush.bf16.msra.mxu1 %v3571_v4 }
 0x2cc   :  { %v1748_v61 = vadd.f32 %v1747_v22, %v1729_v8  ;;  %v3570_v8 = vld [vmem:[%s4722_s5 + $0xe8] sm:$0xff] }
 0x2cd   :  { %v1766_v54 = vpop.f32.mrf.mxu3  ;;  %v1752_v21 = vpop.f32.mrf.mxu2 }
 0x2ce   :  { %v1767_v23 = vadd.f32 %v1766_v54, %v1748_v61  ;;  %v3552_v61 = vld [vmem:[%s4722_s5 + $0x58] sm:$0xff] }
 0x2cf   :  { %v1785_v56 = vpop.f32.mrf.mxu0  ;;  %2475 = vmatpush.bf16.msra.mxu1 %v3570_v8 }
 0x2d0   :  { %v1786_v30 = vadd.f32 %v1785_v56, %v1767_v23  ;;  %v3542_v23 = vld [vmem:[%s4722_s5 + $0x8] sm:$0xff] }
 0x2d1   :  { %v1730_v49 = vpop.f32.mrf.mxu1 }
 0x2d2   :  { %v1731_v6 = vadd.f32 %v1730_v49, %v1712_v43 }
 0x2d4   :  { %v1750_v13 = vadd.f32 %v1749_v3, %v1731_v6  ;;  %v3547_v3 = vld [vmem:[%s4722_s5 + $0x30] sm:$0xff]  ;;  %v3554_v6 = vld [vmem:[%s4722_s5 + $0x68] sm:$0xff] }
 0x2d5   :  { %v1768_v63 = vpop.f32.mrf.mxu3  ;;  %v1754_v15 = vpop.f32.mrf.mxu2  ;;  %2435 = vmatpush.bf16.msrb.mxu2 %v3547_v3 }
 0x2d6   :  { %v1769_v12 = vadd.f32 %v1768_v63, %v1750_v13  ;;  %v3555_v63 = vld [vmem:[%s4722_s5 + $0x70] sm:$0xff]  ;;  %v3569_v13 = vld [vmem:[%s4722_s5 + $0xe0] sm:$0xff] }
 0x2d7   :  { %v1787_v9 = vpop.f32.mrf.mxu0  ;;  %2448 = vmatpush.bf16.msrb.mxu3 %v3555_v63  ;;  %2476 = vmatpush.bf16.msra.mxu1 %v3569_v13 }
 0x2d8   :  { %v1788_v27 = vadd.f32 %v1787_v9, %v1769_v12  ;;  %v3545_v9 = vld [vmem:[%s4722_s5 + $0x20] sm:$0xff]  ;;  %v3560_v12 = vld [vmem:[%s4722_s5 + $0x98] sm:$0xff] }
 0x2d9   :  { %v1733_v52 = vpop.f32.mrf.mxu1  ;;  %2436 = vmatpush.bf16.msrb.mxu2 %v3546_v5  ;;  %2464 = vmatpush.bf16.msra.mxu0 %v3560_v12 }
 0x2da   :  { %v1734_v36 = vadd.f32 %v1733_v52, %v1715_v14  ;;  %v3544_v14 = vld [vmem:[%s4722_s5 + $0x18] sm:$0xff] }
 0x2db   :  { %2449 = vmatpush.bf16.msrb.mxu3 %v3554_v6  ;;  %2477 = vmatpush.bf16.msra.mxu1 %v3568_v17  ;;  %v3590_v17 = vld [vmem:[%s4722_s5 + $0x188] sm:$0xff] }
 0x2dc   :  { %v1753_v31 = vadd.f32 %v1752_v21, %v1734_v36  ;;  %v3567_v21 = vld [vmem:[%s4722_s5 + $0xd0] sm:$0xff]  ;;  %v3550_v36 = vld [vmem:[%s4722_s5 + $0x48] sm:$0xff] }
 0x2dd   :  { %v1771_v25 = vpop.f32.mrf.mxu3  ;;  %2437 = vmatpush.bf16.msrb.mxu2 %v3545_v9  ;;  %2465 = vmatpush.bf16.msra.mxu0 %v3559_v20 }
 0x2de   :  { %v1772_v34 = vadd.f32 %v1771_v25, %v1753_v31  ;;  %v3566_v25 = vld [vmem:[%s4722_s5 + $0xc8] sm:$0xff]  ;;  %v3580_v31 = vld [vmem:[%s4722_s5 + $0x138] sm:$0xff] }
 0x2df   :  { %v1790_v2 = vpop.f32.mrf.mxu0  ;;  %2478 = vmatpush.bf16.msra.mxu1 %v3567_v21 }
 0x2e0   :  { %v1791_v39 = vadd.f32 %v1790_v2, %v1772_v34  ;;  %v3596_v2 = vld [vmem:[%s4722_s5 + $0x1b8] sm:$0xff]  ;;  %v3579_v34 = vld [vmem:[%s4722_s5 + $0x130] sm:$0xff] }
 0x2e1   :  { %v1735_v59 = vpop.f32.mrf.mxu1  ;;  %2438 = vmatpush.bf16.msrb.mxu2 %v3544_v14  ;;  %2466 = vmatpush.bf16.msra.mxu0 %v3558_v24 }
 0x2e2   :  { %v1736_v37 = vadd.f32 %v1735_v59, %v1717_v33  ;;  %v3604_v33 = vld [vmem:[%s4722_s5 + $0x1f8] sm:$0xff] }
 0x2e3   :  { %2479 = vmatpush.bf16.msra.mxu1 %v3566_v25 }
 0x2e4   :  { %v1755_v46 = vadd.f32 %v1754_v15, %v1736_v37  ;;  %v3595_v37 = vld [vmem:[%s4722_s5 + $0x1b0] sm:$0xff]  ;;  %v3578_v15 = vld [vmem:[%s4722_s5 + $0x128] sm:$0xff] }
 0x2e5   :  { %v1773_v41 = vpop.f32.mrf.mxu3  ;;  %2439 = vmatpush.bf16.msrb.mxu2 %v3543_v18  ;;  %v3598_v18 = vld [vmem:[%s4722_s5 + $0x1c8] sm:$0xff] }
 0x2e6   :  { %v1774_v57 = vadd.f32 %v1773_v41, %v1755_v46  ;;  %v3602_v41 = vld [vmem:[%s4722_s5 + $0x1e8] sm:$0xff]  ;;  %v3577_v46 = vld [vmem:[%s4722_s5 + $0x120] sm:$0xff] }
 0x2e7   :  { %v1792_v49 = vpop.f32.mrf.mxu0 }
 0x2e8   :  { %v1793_v51 = vadd.f32 %v1792_v49, %v1774_v57  ;;  %v3593_v57 = vld [vmem:[%s4722_s5 + $0x1a0] sm:$0xff] }
 0x2e9   :  { %v1804_v10 = vpop.f32.mrf.mxu1  ;;  %2440 = vmatpush.bf16.msrb.mxu2 %v3542_v23 }
 0x2ea   :  { %v1805_v35 = vadd.f32 %v1804_v10, %v1786_v30  ;;  %v3553_v10 = vld [vmem:[%s4722_s5 + $0x60] sm:$0xff] }
 0x2eb   :  { %2450 = vmatpush.bf16.msrb.mxu3 %v3553_v10  ;;  %v3565_v30 = vld [vmem:[%s4722_s5 + $0xc0] sm:$0xff] }
 0x2ec   :  { %v1814_v40 = vmax.f32 %v1805_v35, 0.0  ;;  %2480 = vmatpush.bf16.msra.mxu1 %v3565_v30  ;;  %v3587_v35 = vld [vmem:[%s4722_s5 + $0x170] sm:$0xff] }
 0x2ed   :  { %2441 = vmatpush.bf16.msrb.mxu2 %v3541_v26 }
 0x2ee   :  { %v1818_v47 = vrot.slane %v1814_v40, 1 }
 0x2ef   :  { %2451 = vmatpush.bf16.msrb.mxu3 %v3552_v61 }
 0x2f0   :  { %2525 = vmatpush.bf16.msrb.mxu1 %v3604_v33 }
 0x2f1   :  { %v1806_v28 = vpop.f32.mrf.mxu1  ;;  %2486 = vmatpush.bf16.msra.mxu2 %v3580_v31 }
 0x2f2   :  { %v1807_v32 = vadd.f32 %v1806_v28, %v1788_v27  ;;  %v3549_v27 = vld [vmem:[%s4722_s5 + $0x40] sm:$0xff] }
 0x2f3   :  { %2452 = vmatpush.bf16.msrb.mxu3 %v3551_v19  ;;  %v3557_v28 = vld [vmem:[%s4722_s5 + $0x80] sm:$0xff] }
 0x2f4   :  { %v1815_v38 = vmax.f32 %v1807_v32, 0.0  ;;  %v3588_v32 = vld [vmem:[%s4722_s5 + $0x178] sm:$0xff]  ;;  %2467 = vmatpush.bf16.msra.mxu0 %v3557_v28 }
 0x2f5   :  { %2487 = vmatpush.bf16.msra.mxu2 %v3579_v34  ;;  %v3589_v34 = vld [vmem:[%s4722_s5 + $0x180] sm:$0xff] }
 0x2f6   :  { %v1819_v44 = vrot.slane %v1815_v38, 1 }
 0x2f7   :  { %2453 = vmatpush.bf16.msrb.mxu3 %v3550_v36 }
 0x2f8   :  { %v1824_v1 = vsel %vm222_vm3, %v1818_v47, %v1819_v44  ;;  %2512 = vmatpush.bf16.msrb.mxu0 %v3596_v2  ;;  %v3581_v2 = vld [vmem:[%s4722_s5 + $0x140] sm:$0xff] }
 0x2f9   :  { %v1809_v42 = vpop.f32.mrf.mxu1  ;;  %v4486_v22 = vmax.f32 %v1814_v40, %v1824_v1  ;;  %v3594_v40 = vld [vmem:[%s4722_s5 + $0x1a8] sm:$0xff]  ;;  %2488 = vmatpush.bf16.msra.mxu2 %v3578_v15  ;;  %v3584_v1 = vld [vmem:[%s4722_s5 + $0x158] sm:$0xff] }
 0x2fa   :  { %v1810_v45 = vadd.f32 %v1809_v42, %v1791_v39  ;;  %v3586_v39 = vld [vmem:[%s4722_s5 + $0x168] sm:$0xff] }
 0x2fb   :  { %2454 = vmatpush.bf16.msrb.mxu3 %v3549_v27 }
 0x2fc   :  { %v1816_v48 = vmax.f32 %v1810_v45, 0.0  ;;  %2513 = vmatpush.bf16.msrb.mxu0 %v3595_v37 }
 0x2fd   :  { %2489 = vmatpush.bf16.msra.mxu2 %v3577_v46 }
 0x2fe   :  { %v1820_v50 = vrot.slane %v1816_v48, 1 }
 0x2ff   :  { %2499 = vmatpush.bf16.msra.mxu3 %v3588_v32  ;;  %v3573_v32 = vld [vmem:[%s4722_s5 + $0x100] sm:$0xff] }
 0x300   :  { %v1823_v52 = vsel %vm222_vm3, %v1819_v44, %v1820_v50  ;;  %v3585_v44 = vld [vmem:[%s4722_s5 + $0x160] sm:$0xff]  ;;  %2514 = vmatpush.bf16.msrb.mxu0 %v3594_v40 }
 0x301   :  { %v1811_v53 = vpop.f32.mrf.mxu1  ;;  %v4488_v54 = vmax.f32 %v1815_v38, %v1823_v52  ;;  %v3603_v38 = vld [vmem:[%s4722_s5 + $0x1f0] sm:$0xff] }
 0x302   :  { %v1812_v55 = vadd.f32 %v1811_v53, %v1793_v51  ;;  %2526 = vmatpush.bf16.msrb.mxu1 %v3603_v38  ;;  %v3592_v51 = vld [vmem:[%s4722_s5 + $0x198] sm:$0xff] }
 0x303   :  { %v3733_v0 = vpack.i.bf16 %v4488_v54, %v4486_v22  ;;  %2500 = vmatpush.bf16.msra.mxu3 %v3587_v35  ;;  %v3597_v35 = vld [vmem:[%s4722_s5 + $0x1c0] sm:$0xff] }
 0x304   :  { %v1817_v56 = vmax.f32 %v1812_v55, 0.0  ;;  %2515 = vmatpush.bf16.msrb.mxu0 %v3593_v57  ;;  %v3600_v55 = vld [vmem:[%s4722_s5 + $0x1d8] sm:$0xff] }
 0x305   :  { %3734 = vrot.lane.b32.xlu1 %v3733_v0, %s3777_s22 }
 0x306   :  { %v1821_v29 = vrot.slane %v1817_v56, 1  ;;  %2527 = vmatpush.bf16.msrb.mxu1 %v3602_v41 }
 0x307   :  { %2501 = vmatpush.bf16.msra.mxu3 %v3586_v39 }
 0x308   :  { %v1825_v58 = vsel %vm222_vm3, %v1821_v29, %v1818_v47  ;;  %v1822_v59 = vsel %vm222_vm3, %v1820_v50, %v1821_v29  ;;  %v3601_v47 = vld [vmem:[%s4722_s5 + $0x1e0] sm:$0xff]  ;;  %v3576_v50 = vld [vmem:[%s4722_s5 + $0x118] sm:$0xff]  ;;  %v3575_v29 = vld [vmem:[%s4722_s5 + $0x110] sm:$0xff]  ;;  %vm1845_vm3 = vcmask 1040384   ;;  %2516 = vmatpush.bf16.msrb.mxu0 %v3592_v51 }
 0x309   :  { %v4497_v60 = vmax.f32 %v1817_v56, %v1825_v58  ;;  %v4499_v62 = vmax.f32 %v1816_v48, %v1822_v59  ;;  %2490 = vmatpush.bf16.msra.mxu2 %v3576_v50  ;;  %v3583_v58 = vld [vmem:[%s4722_s5 + $0x150] sm:$0xff] }
 0x30a   :  { %2528 = vmatpush.bf16.msrb.mxu1 %v3601_v47  ;;  %v3606_v47 = vld [vmem:[%s4724_s7 + $0x8] sm:$0xff] }
 0x30b   :  { %v3738_v43 = vpack.i.bf16 %v4497_v60, %v4499_v62  ;;  %2502 = vmatpush.bf16.msra.mxu3 %v3585_v44 }
 0x30d   :  { %3739 = vrot.lane.b32.xlu2 %v3738_v43, %s3777_s22  ;;  %2491 = vmatpush.bf16.msra.mxu2 %v3575_v29 }
 0x30e   :  { %2529 = vmatpush.bf16.msrb.mxu1 %v3600_v55 }
 0x30f   :  { %2503 = vmatpush.bf16.msra.mxu3 %v3584_v1  ;;  %v3745_v1 = vld [vmem:[%s4723_s6] ss:$0 sm:$0xff] }
 0x313   :  { %2504 = vmatpush.bf16.msra.mxu3 %v3583_v58 }
 0x367   :  { %v3740_v42 = vpop.permute.xlu2 %3739 }
 0x368   :  { %v3742_v45 = vunpack.i.h.bf16 %v3740_v42  ;;  %v3741_v48 = vunpack.i.l.bf16 %v3740_v42 }
 0x36a   :  { %v1841_v49 = vmax.f32 %v4497_v60, %v3742_v45  ;;  %v4647_v52 = vmax.f32 %v4499_v62, %v3741_v48  ;;  %v3591_v60 = vld [vmem:[%s4722_s5 + $0x190] sm:$0xff]  ;;  %v3605_v48 = vld [vmem:[%s4724_s7] sm:$0xff] }
 0x36b   :  { %v3599_v62 = vld [vmem:[%s4722_s5 + $0x1d0] sm:$0xff]  ;;  %2517 = vmatpush.bf16.msrb.mxu0 %v3591_v60 }
 0x36c   :  { %v1872_v59 = vrot.slane %v1841_v49, 7  ;;  %v1880_v43 = vrot.slane %v1841_v49, 1  ;;  %v1887_v3 = vrot.slane %v1841_v49, 3  ;;  %v1894_v4 = vrot.slane %v1841_v49, 5  ;;  %2530 = vmatpush.bf16.msrb.mxu1 %v3599_v62 }
 0x36d   :  { %v1843_v5 = vrot.slane %v4647_v52, 7  ;;  %v1852_v6 = vrot.slane %v4647_v52, 1  ;;  %v1859_v16 = vrot.slane %v4647_v52, 3  ;;  %v1866_v27 = vrot.slane %v4647_v52, 5 }
 0x36f   :  { %2518 = vmatpush.bf16.msrb.mxu0 %v3590_v17 }
 0x370   :  { %2531 = vmatpush.bf16.msrb.mxu1 %v3598_v18 }
 0x373   :  { %2519 = vmatpush.bf16.msrb.mxu0 %v3589_v34 }
 0x374   :  { %2532 = vmatpush.bf16.msrb.mxu1 %v3597_v35 }
 0x377   :  { %v3735_v53 = vpop.permute.xlu1 %3734 }
 0x378   :  { %v3737_v0 = vunpack.i.h.bf16 %v3735_v53  ;;  %v3736_v56 = vunpack.i.l.bf16 %v3735_v53 }
 0x37a   :  { %v1839_v63 = vmax.f32 %v4488_v54, %v3737_v0  ;;  %v1838_v7 = vmax.f32 %v4486_v22, %v3736_v56  ;;  %v3574_v54 = vld [vmem:[%s4722_s5 + $0x108] sm:$0xff] }
 0x37b   :  { %v3582_v22 = vld [vmem:[%s4722_s5 + $0x148] sm:$0xff]  ;;  %2492 = vmatpush.bf16.msra.mxu2 %v3574_v54 }
 0x37c   :  { %v1874_v8 = vsel %vm1845_vm3, %v1839_v63, %v1872_v59  ;;  %v1878_v9 = vrot.slane %v1839_v63, 2  ;;  %v1885_v10 = vrot.slane %v1839_v63, 4  ;;  %v1892_v11 = vrot.slane %v1839_v63, 6  ;;  %2505 = vmatpush.bf16.msra.mxu3 %v3582_v22  ;;  %v3746_v22 = vld [vmem:[%s4725_s8] ss:$0 sm:$0xff] }
 0x37d   :  { %v1875_v13 = vpack.c.bf16 %v1874_v8, %v1874_v8  ;;  %v1846_v14 = vsel %vm1845_vm3, %v1838_v7, %v1843_v5  ;;  %v1850_v61 = vrot.slane %v1838_v7, 2  ;;  %v1857_v12 = vrot.slane %v1838_v7, 4 }
 0x37e   :  { %v1882_v19 = vsel %vm1845_vm3, %v1878_v9, %v1880_v43  ;;  %v1889_v20 = vsel %vm1845_vm3, %v1885_v10, %v1887_v3  ;;  %v1896_v21 = vsel %vm1845_vm3, %v1892_v11, %v1894_v4  ;;  %v1847_v23 = vpack.c.bf16 %v1846_v14, %v1846_v14 }
 0x37f   :  { %1876 = vst [vmem:[#allocation4 + $0x4] sm:$0x1] %v1875_v13  ;;  %v1883_v36 = vpack.c.bf16 %v1882_v19, %v1882_v19  ;;  %v1890_v24 = vpack.c.bf16 %v1889_v20, %v1889_v20  ;;  %v1897_v25 = vpack.c.bf16 %v1896_v21, %v1896_v21  ;;  %v1854_v26 = vsel %vm1845_vm3, %v1850_v61, %v1852_v6 }
 0x380   :  { %1848 = vst [vmem:[#allocation4] sm:$0x1] %v1847_v23  ;;  %v1855_v28 = vpack.c.bf16 %v1854_v26, %v1854_v26  ;;  %v1861_v30 = vsel %vm1845_vm3, %v1857_v12, %v1859_v16  ;;  %v1864_v31 = vrot.slane %v1838_v7, 6  ;;  %2493 = vmatpush.bf16.msra.mxu2 %v3573_v32  ;;  %2506 = vmatpush.bf16.msra.mxu3 %v3581_v2 }
 0x381   :  { %1884 = vst [vmem:[#allocation4 + $0x5] sm:$0x1] %v1883_v36  ;;  %v1862_v33 = vpack.c.bf16 %v1861_v30, %v1861_v30 }
 0x382   :  { %1891 = vst [vmem:[#allocation4 + $0x6] sm:$0x1] %v1890_v24  ;;  %v1868_v37 = vsel %vm1845_vm3, %v1864_v31, %v1866_v27 }
 0x383   :  { %1898 = vst [vmem:[#allocation4 + $0x7] sm:$0x1] %v1897_v25  ;;  %v1869_v38 = vpack.c.bf16 %v1868_v37, %v1868_v37 }
 0x384   :  { %1856 = vst [vmem:[#allocation4 + $0x1] sm:$0x1] %v1855_v28 }
 0x385   :  { %1863 = vst [vmem:[#allocation4 + $0x2] sm:$0x1] %v1862_v33 }
 0x386   :  { %1870 = vst [vmem:[#allocation4 + $0x3] sm:$0x1] %v1869_v38 }
 0x38d   :  { %v1899_v15 = vld [vmem:[#allocation4] sm:$0xff] }
 0x38e   :  { %2033 = vst [vmem:[#allocation1] ss:$9 sm:$0xff] %v1899_v15 }
 0x395   :  { %v2034_v39 = vld [vmem:[#allocation1] sm:$0xff]  ;;  %v2035_v40 = vld [vmem:[#allocation1 + $0x9] sm:$0xff]  ;;  %v2036_v41 = vld [vmem:[#allocation1 + $0x12] sm:$0xff] }
 0x396   :  { %2442 = vmatmul.bf16.vlgmr.msrb.gmra.mxu2 %v2034_v39  ;;  %2455 = vmatmul.bf16.vlgmr.msrb.gmra.mxu3 %v2035_v40  ;;  %v2037_v42 = vld [vmem:[#allocation1 + $0x1b] sm:$0xff]  ;;  %v2038_v46 = vld [vmem:[#allocation1 + $0x24] sm:$0xff]  ;;  %v2039_v44 = vld [vmem:[#allocation1 + $0x2d] sm:$0xff] }
 0x397   :  { %2468 = vmatmul.bf16.vlgmr.msra.gmra.mxu0 %v2036_v41  ;;  %2481 = vmatmul.bf16.vlgmr.msra.gmra.mxu1 %v2037_v42  ;;  %v2040_v45 = vld [vmem:[#allocation1 + $0x36] sm:$0xff]  ;;  %v2041_v57 = vld [vmem:[#allocation1 + $0x3f] sm:$0xff] }
 0x398   :  { %2570 = vmatpush.bf16.msrb.mxu2 %v3606_v47 }
 0x39c   :  { %2571 = vmatpush.bf16.msrb.mxu2 %v3605_v48 }
 0x3a6   :  { %2494 = vmatmul.bf16.vlgmr.msra.gmra.mxu2 %v2038_v46  ;;  %2507 = vmatmul.bf16.vlgmr.msra.gmra.mxu3 %v2039_v44 }
 0x3a7   :  { %2520 = vmatmul.bf16.vlgmr.msrb.gmra.mxu0 %v2040_v45  ;;  %2533 = vmatmul.bf16.vlgmr.msrb.gmra.mxu1 %v2041_v57 }
 0x414   :  { %v2469_v49 = vpop.f32.mrf.mxu0  ;;  %v2482_v50 = vpop.f32.mrf.mxu1 }
 0x419   :  { %v2443_v51 = vpop.f32.mrf.mxu2  ;;  %v2456_v52 = vpop.f32.mrf.mxu3 }
 0x41a   :  { %v2444_v53 = vadd.f32 %v3745_v1, %v2443_v51 }
 0x41c   :  { %v2471_v55 = vpop.f32.mrf.mxu0  ;;  %v2484_v0 = vpop.f32.mrf.mxu1  ;;  %v2457_v56 = vadd.f32 %v2456_v52, %v2444_v53 }
 0x41e   :  { %v2470_v59 = vadd.f32 %v2469_v49, %v2457_v56 }
 0x420   :  { %v2483_v43 = vadd.f32 %v2482_v50, %v2470_v59 }
 0x421   :  { %v2445_v29 = vpop.f32.mrf.mxu2  ;;  %v2458_v58 = vpop.f32.mrf.mxu3 }
 0x424   :  { %v2521_v60 = vpop.f32.mrf.mxu0  ;;  %v2534_v62 = vpop.f32.mrf.mxu1 }
 0x429   :  { %v2495_v3 = vpop.f32.mrf.mxu2  ;;  %v2508_v63 = vpop.f32.mrf.mxu3 }
 0x42a   :  { %v2496_v7 = vadd.f32 %v2495_v3, %v2483_v43 }
 0x42c   :  { %v2509_v4 = vadd.f32 %v2508_v63, %v2496_v7  ;;  %v2523_v5 = vpop.f32.mrf.mxu0  ;;  %v2536_v6 = vpop.f32.mrf.mxu1 }
 0x42e   :  { %v2522_v16 = vadd.f32 %v2521_v60, %v2509_v4 }
 0x430   :  { %v2535_v8 = vadd.f32 %v2534_v62, %v2522_v16 }
 0x431   :  { %v2497_v9 = vpop.f32.mrf.mxu2  ;;  %v2510_v10 = vpop.f32.mrf.mxu3 }
 0x432   :  { %v2538_v11 = vmax.f32 %v2535_v8, 0.0 }
 0x434   :  { %v2539_v54 = vpack.c.bf16 %v2538_v11, %v2538_v11 }
 0x436   :  { %3404 = vmatmul.msk.bf16.vlgmr.msrb.gmra.mxu2 %vm2560_vm4, %v2539_v54 }
 0x4b9   :  { %v2573_v13 = vpop.f32.mrf.mxu2 }
 0x4ba   :  { %v2574_v14 = vadd.f32 %v3746_v22, %v2573_v13 }
 0x4bc   :  { %2577 = vst [vmem:[#allocation5] sm:$0x3] %v2574_v14 }
 0x4bd   :  { %2588 = dma.vmem_to_hbm [thread:$0]  %s2584_s16, 32, %s2586_s0, [#allocation6]  }
 0x4c1   :  { %v2575_v61 = vpop.f32.mrf.mxu2 }
 0x4c2   :  { %3771 = dma.done.wait [#allocation6], 32  }
 0x4c3   :  { %3772 = vsyncadd [#allocation6], 4294967264 }
 0x4c4   :  { %2593 = vsyncpa [#allocation6], 1 }

</bundles_post_ra>
